<compile_context>
chip_gen: v7x
topology: tpu7x:2x2x1
jax: 0.10.0
libtpu: 0.0.40
codegen_flags: <defaults>
</compile_context>

<pallas_src>
import numpy as np
import jax
import jax.numpy as jnp
from jax.experimental import pallas as pl
from jax.experimental.pallas import tpu as pltpu

# Small, module-consistent hyper-parameters.
HIDDEN = 32
NLAYERS = 2
NTOKENS = 64
NHEAD = 8                      # module default
HEAD_DIM = HIDDEN // NHEAD
FFN = HIDDEN * 4               # dim_feedforward = hidden_size * 4
PAD = 0
LN_EPS = 1e-5
NEG_SLOPE = 0.01               # nn.LeakyReLU default
MASK_NEG = -1e30               # stands in for log(0); exp() underflows to exactly 0
OUT_PAD = 128                  # lane-dense output: [logits(64) | raw(32) | zeros(32)]

# Rows of the packed per-layer "small vectors" blob.
VEC_G1, VEC_B1, VEC_G2, VEC_B2, VEC_BO, VEC_BF2 = range(6)
NVEC = 6


def _layer_norm(x, g, b):
  mu = jnp.mean(x, axis=-1, keepdims=True)
  xc = x - mu
  var = jnp.mean(xc * xc, axis=-1, keepdims=True)
  return xc * jax.lax.rsqrt(var + LN_EPS) * g + b


def structformer_fwd_kernel(
    h_ref,      # (R, H)             R = batch_chunk*L rows of token embeddings
    bias_ref,   # (NLAYERS, RR, H)   RR = batch_chunk*L*L; head bias replicated over head lanes
    repi_ref,   # (RR, R)            one-hot: row (b,i,j) -> col (b,i)
    repj_ref,   # (RR, R)            one-hot: row (b,i,j) -> col (b,j)
    sel_ref,    # (R, RR)            one-hot: (b,i) <- rows (b,i,*)   (= repi^T)
    hsum_ref,   # (H, H)             1 iff same head; replaces the e_dh/e_hd pair
    wqkv_ref,   # (NLAYERS, H, 3H)   bf16, Q part pre-scaled by head_dim**-0.5
    bqkv_ref,   # (NLAYERS, 1, 3H)
    wo_ref,     # (NLAYERS, H, H)    bf16
    w1_ref,     # (NLAYERS, H, FFN)  bf16
    bf1_ref,    # (NLAYERS, 1, FFN)
    w2_ref,     # (NLAYERS, FFN, H)  bf16
    vec_ref,    # (NLAYERS, NVEC, H) g1, b1, g2, b2, bo, bf2
    fgb_ref,    # (2, H)             final LayerNorm gamma / beta
    wcomb_ref,  # (H, OUT_PAD)       [tied emb.T | I_H | 0]
    bcomb_ref,  # (1, OUT_PAD)
    out_ref,    # out: (R, OUT_PAD)  [logits | raw | 0]
):
  """Both TransformerLayers (pre-norm MHA + pre-norm FFN) + final LN + tied head."""
  H = HIDDEN
  R = h_ref.shape[0]
  L = repi_ref.shape[0] // R

  h = h_ref[...]                                                  # (R, H) f32
  rep_i = repi_ref[...]
  rep_j = repj_ref[...]
  sel = sel_ref[...]
  hsum = hsum_ref[...]

  for l in range(NLAYERS):                                        # static unroll
    vec = vec_ref[l]                                              # (NVEC, H)

    # ---------- pre-norm multi-head self-attention ----------
    hn = _layer_norm(h, vec[VEC_G1:VEC_G1 + 1], vec[VEC_B1:VEC_B1 + 1])
    qkv = (jnp.dot(hn.astype(jnp.bfloat16), wqkv_ref[l],
                   preferred_element_type=jnp.float32) + bqkv_ref[l])       # (R, 3H)
    q = qkv[:, :H]                     # head_dim**-0.5 already folded into W / b
    kv = qkv[:, H:]                    # [k | v]

    # Block-diagonal replication to pair space (b, i, j) — no transposes/gathers.
    q_rep = jnp.dot(rep_i, q, preferred_element_type=jnp.float32)           # (RR, H)
    kv_rep = jnp.dot(rep_j, kv, preferred_element_type=jnp.float32)         # (RR, 2H)
    k_rep = kv_rep[:, :H]
    v_rep = kv_rep[:, H:]

    # Head-summed scores, replicated across each head's HEAD_DIM lanes (32 lanes).
    s = (jnp.dot(q_rep * k_rep, hsum, preferred_element_type=jnp.float32)
         + bias_ref[l])                                                      # (RR, H)
    s3 = s.reshape(R, L, H)
    s3 = s3 - jnp.max(s3, axis=1, keepdims=True)                 # softmax over keys j
    p = jnp.exp(s3).reshape(R * L, H)                                        # (RR, H)

    # One MXU push for both the weighted value sum and the softmax denominator.
    nd = jnp.dot(sel, jnp.concatenate([p * v_rep, p], axis=1),
                 preferred_element_type=jnp.float32)                         # (R, 2H)
    attn = nd[:, :H] * pl.reciprocal(nd[:, H:], approx=True)
    attn = (jnp.dot(attn.astype(jnp.bfloat16), wo_ref[l],
                    preferred_element_type=jnp.float32) + vec[VEC_BO:VEC_BO + 1])
    h = h + attn                                                 # residual 1 (dropout = id)

    # ---------- pre-norm feed-forward ----------
    fn = _layer_norm(h, vec[VEC_G2:VEC_G2 + 1], vec[VEC_B2:VEC_B2 + 1])
    f1 = (jnp.dot(fn.astype(jnp.bfloat16), w1_ref[l],
                  preferred_element_type=jnp.float32) + bf1_ref[l])
    f1 = jnp.where(f1 >= 0, f1, NEG_SLOPE * f1)                  # LeakyReLU
    f2 = (jnp.dot(f1.astype(jnp.bfloat16), w2_ref[l],
                  preferred_element_type=jnp.float32) + vec[VEC_BF2:VEC_BF2 + 1])
    h = h + f2                                                   # residual 2 (dropout = id)

  # ---------- final LayerNorm + tied output projection ----------
  fgb = fgb_ref[...]
  raw = _layer_norm(h, fgb[0:1], fgb[1:2])                       # self.drop == identity (eval)
  # Single unmasked 128-lane store: lanes [0:64] logits, [64:96] raw (identity block).
  out_ref[...] = (jnp.dot(raw, wcomb_ref[...], preferred_element_type=jnp.float32)
                  + bcomb_ref[...])


def _full_spec(shape):
  rank = len(shape)
  return pl.BlockSpec(shape, lambda s, _r=rank: (0,) * _r)


def _make_consts(bc, L):
  """Block-diagonal one-hot replication / selection matrices and the head-sum
  matrix, built host-side so no iota/compare work runs inside the kernel."""
  R, RR = bc * L, bc * L * L
  rows = np.arange(RR)
  rb, ri, rj = rows // (L * L), (rows // L) % L, rows % L
  cols = np.arange(R)
  cb, ct = cols // L, cols % L
  rep_i = ((rb[:, None] == cb[None, :]) & (ri[:, None] == ct[None, :])).astype(np.float32)
  rep_j = ((rb[:, None] == cb[None, :]) & (rj[:, None] == ct[None, :])).astype(np.float32)
  sel = np.ascontiguousarray(rep_i.T)
  d = np.arange(HIDDEN)
  hsum = (d[:, None] // HEAD_DIM == d[None, :] // HEAD_DIM).astype(np.float32)
  return rep_i, rep_j, sel, hsum


def structformer_fused_call(prep, h2d, bias, *, batch, length, batch_chunk):
  """One pallas_call for the whole forward (both layers + final LN + tied head).

  grid = (batch // batch_chunk,).  batch_chunk == batch collapses the grid to a
  single step (lowest overhead on single-TensorCore v5e/v6e); on v7x pass
  batch_chunk = batch // 2 to keep a "parallel" axis so both TensorCores work.
  """
  assert batch % batch_chunk == 0
  nsteps = batch // batch_chunk
  R = batch_chunk * length
  RR = batch_chunk * length * length
  rep_i, rep_j, sel, hsum = _make_consts(batch_chunk, length)

  in_specs = [
      pl.BlockSpec((R, HIDDEN), lambda s: (s, 0)),
      pl.BlockSpec((NLAYERS, RR, HIDDEN), lambda s: (0, s, 0)),
      _full_spec(rep_i.shape),
      _full_spec(rep_j.shape),
      _full_spec(sel.shape),
      _full_spec(hsum.shape),
      _full_spec(prep["wqkv"].shape),
      _full_spec(prep["bqkv"].shape),
      _full_spec(prep["wo"].shape),
      _full_spec(prep["w1"].shape),
      _full_spec(prep["bf1"].shape),
      _full_spec(prep["w2"].shape),
      _full_spec(prep["vec"].shape),
      _full_spec(prep["final_gb"].shape),
      _full_spec(prep["w_comb"].shape),
      _full_spec(prep["b_comb"].shape),
  ]
  out_spec = pl.BlockSpec((R, OUT_PAD), lambda s: (s, 0))

  return pl.pallas_call(
      structformer_fwd_kernel,
      grid=(nsteps,),
      in_specs=in_specs,
      out_specs=out_spec,
      out_shape=jax.ShapeDtypeStruct((batch * length, OUT_PAD), jnp.float32),
      compiler_params=pltpu.CompilerParams(dimension_semantics=("parallel",)),
  )(h2d, bias, rep_i, rep_j, sel, hsum,
    prep["wqkv"], prep["bqkv"], prep["wo"], prep["w1"], prep["bf1"],
    prep["w2"], prep["vec"], prep["final_gb"], prep["w_comb"], prep["b_comb"])


def init_params(key):
  keys = jax.random.split(key, 1 + NLAYERS)
  params = {
      "emb": jax.random.uniform(keys[0], (NTOKENS, HIDDEN), jnp.float32, -0.1, 0.1),
      "out_bias": jnp.zeros((1, NTOKENS), jnp.float32),        # output_layer.bias.fill_(0)
      "norm_g": jnp.ones((1, HIDDEN), jnp.float32),
      "norm_b": jnp.zeros((1, HIDDEN), jnp.float32),
      "layers": [],
  }

  def lin(k, fin, fout):
    s = fin ** -0.5
    return jax.random.uniform(k, (fin, fout), jnp.float32, -s, s)

  for i in range(NLAYERS):
    lk = jax.random.split(keys[1 + i], 7)
    params["layers"].append({
        "g1": jnp.ones((1, HIDDEN), jnp.float32),
        "b1": jnp.zeros((1, HIDDEN), jnp.float32),
        "wq": lin(lk[0], HIDDEN, HIDDEN), "bq": jnp.zeros((1, HIDDEN), jnp.float32),
        "wk": lin(lk[1], HIDDEN, HIDDEN), "bk": jnp.zeros((1, HIDDEN), jnp.float32),
        "wv": lin(lk[2], HIDDEN, HIDDEN), "bv": jnp.zeros((1, HIDDEN), jnp.float32),
        "wo": lin(lk[3], HIDDEN, HIDDEN), "bo": jnp.zeros((1, HIDDEN), jnp.float32),
        "g2": jnp.ones((1, HIDDEN), jnp.float32),
        "b2": jnp.zeros((1, HIDDEN), jnp.float32),
        "w1": lin(lk[4], HIDDEN, FFN), "bf1": jnp.zeros((1, FFN), jnp.float32),
        "w2": lin(lk[5], FFN, HIDDEN), "bf2": jnp.zeros((1, HIDDEN), jnp.float32),
        # relative_bias param is zeros in the original init; use small values to
        # exercise the code path deterministically.
        "rel_bias": 0.01 * jax.random.normal(lk[6], (NHEAD, 256), jnp.float32),
    })
  return params


def prepare_params(params):
  """One-time packing for the fused kernel: stack per-layer params along NLAYERS,
  pack Q/K/V into one (H, 3H) matmul (head_dim**-0.5 folded into Q), pack the
  (1, H) vectors into one blob, cast matmul weights to bf16, and build the
  combined lane-dense output matrix [tied emb.T | I_H | 0] so logits and raw
  come out of a single unmasked 128-lane store."""
  scale = float(HEAD_DIM) ** -0.5
  wqkv, bqkv, wo, w1, bf1, w2, vec, rel = [], [], [], [], [], [], [], []
  for lp in params["layers"]:
    wqkv.append(jnp.concatenate([lp["wq"] * scale, lp["wk"], lp["wv"]], axis=1))
    bqkv.append(jnp.concatenate([lp["bq"] * scale, lp["bk"], lp["bv"]], axis=1))
    wo.append(lp["wo"])
    w1.append(lp["w1"])
    bf1.append(lp["bf1"])
    w2.append(lp["w2"])
    vec.append(jnp.concatenate(
        [lp["g1"], lp["b1"], lp["g2"], lp["b2"], lp["bo"], lp["bf2"]], axis=0))
    rel.append(lp["rel_bias"])
  w_comb = jnp.zeros((HIDDEN, OUT_PAD), jnp.float32)
  w_comb = w_comb.at[:, :NTOKENS].set(params["emb"].T)            # tied weights, cached once
  w_comb = w_comb.at[:, NTOKENS:NTOKENS + HIDDEN].set(jnp.eye(HIDDEN, dtype=jnp.float32))
  b_comb = jnp.zeros((1, OUT_PAD), jnp.float32)
  b_comb = b_comb.at[:, :NTOKENS].set(params["out_bias"])
  return {
      "emb": params["emb"],
      "rel_bias": jnp.stack(rel),                                # (NLAYERS, NHEAD, 256)
      "wqkv": jnp.stack(wqkv).astype(jnp.bfloat16),
      "bqkv": jnp.stack(bqkv),
      "wo": jnp.stack(wo).astype(jnp.bfloat16),
      "w1": jnp.stack(w1).astype(jnp.bfloat16),
      "bf1": jnp.stack(bf1),
      "w2": jnp.stack(w2).astype(jnp.bfloat16),
      "vec": jnp.stack(vec),
      "final_gb": jnp.concatenate([params["norm_g"], params["norm_b"]], axis=0),
      "w_comb": w_comb,
      "b_comb": b_comb,
  }


# TODO(synk): StructFormer's parser / structural attention-mask path (parse, compute_block, compute_head, generate_mask) is not implemented; this follows the base Transformer relative-bias forward path.
@jax.jit
def transformer_forward(prep, x, pos):
  """Matches Transformer.forward (eval mode, pos_emb=False, relative_bias=True)."""
  del pos                                                        # pos_emb=False
  B, L = x.shape
  h2d = prep["emb"][x].reshape(B * L, HIDDEN)                    # embedding gather (glue)

  # visibility(): log of pad mask, added to attention scores along the key axis j.
  log_vis = jnp.where(x != PAD, 0.0, MASK_NEG).astype(jnp.float32)        # (B, L)

  # Relative position bias: each head h uses its own row rel_bias[l, h, |i-j| + 127].
  rel_idx = jnp.abs(jnp.arange(L)[:, None] - jnp.arange(L)[None, :]) + 127
  rel = prep["rel_bias"][:, :, rel_idx]                          # (NLAYERS, NHEAD, L, L)
  bias = rel[:, None] + log_vis[None, :, None, None, :]          # (NLAYERS, B, NHEAD, L, L)
  # Kernel layout: rows (b, i, j), lanes = HIDDEN with each head's bias replicated
  # over its HEAD_DIM lanes -> lane-dense score adds / softmax inside the kernel.
  bias = jnp.transpose(bias, (0, 1, 3, 4, 2))                    # (NLAYERS, B, L, L, NHEAD)
  bias = jnp.repeat(bias, HEAD_DIM, axis=-1).reshape(NLAYERS, B * L * L, HIDDEN)

  out = structformer_fused_call(prep, h2d, bias, batch=B, length=L, batch_chunk=B)
  logits = out[:, :NTOKENS]                                      # (B*L, NTOKENS)
  raw = out[:, NTOKENS:NTOKENS + HIDDEN].reshape(B, L, HIDDEN)
  return logits, {"raw_output": raw}


if __name__ == "__main__":
  key = jax.random.PRNGKey(0)
  pkey, xkey = jax.random.split(key)
  params = init_params(pkey)
  prep = prepare_params(params)                                  # one-time packing

  B, L = 2, 8
  x = jax.random.randint(xkey, (B, L), 1, NTOKENS)
  x = x.at[0, -2:].set(PAD)                                      # pad tokens exercise masking
  pos = jnp.broadcast_to(jnp.arange(L), (B, L))                  # unused (pos_emb=False)

  logits, state = transformer_forward(prep, x, pos)
  jax.block_until_ready((logits, state["raw_output"]))
  assert logits.shape == (B * L, NTOKENS)
  assert state["raw_output"].shape == (B, L, HIDDEN)
  print("KERNEL_OK")
</pallas_src>

<mosaic_0001>
module attributes {stable_mosaic.version = 11 : i64} {
  func.func @structformer_fwd_kernel(%arg0: i32, %arg1: memref<16x32xf32, #tpu.memory_space<vmem>>, %arg2: memref<2x128x32xf32, #tpu.memory_space<vmem>>, %arg3: memref<128x16xf32, #tpu.memory_space<vmem>>, %arg4: memref<128x16xf32, #tpu.memory_space<vmem>>, %arg5: memref<16x128xf32, #tpu.memory_space<vmem>>, %arg6: memref<32x32xf32, #tpu.memory_space<vmem>>, %arg7: memref<2x32x96xbf16, #tpu.memory_space<vmem>>, %arg8: memref<2x1x96xf32, #tpu.memory_space<vmem>>, %arg9: memref<2x32x32xbf16, #tpu.memory_space<vmem>>, %arg10: memref<2x32x128xbf16, #tpu.memory_space<vmem>>, %arg11: memref<2x1x128xf32, #tpu.memory_space<vmem>>, %arg12: memref<2x128x32xbf16, #tpu.memory_space<vmem>>, %arg13: memref<2x6x32xf32, #tpu.memory_space<vmem>>, %arg14: memref<2x32xf32, #tpu.memory_space<vmem>>, %arg15: memref<32x128xf32, #tpu.memory_space<vmem>>, %arg16: memref<1x128xf32, #tpu.memory_space<vmem>>, %arg17: memref<16x128xf32, #tpu.memory_space<vmem>>) attributes {dimension_semantics = [#tpu.dimension_semantics<parallel>], iteration_bounds = array<i64: 1>, scalar_prefetch = 0 : i64, scratch_operands = 0 : i64, tpu.core_type = #tpu.core_type<tc>, window_params = [{transform_indices = @transform_0, window_bounds = array<i64: 16, 32>}, {transform_indices = @transform_1, window_bounds = array<i64: 2, 128, 32>}, {pipeline_mode = #tpu.pipeline_mode<synchronous>, transform_indices = @transform_2, window_bounds = array<i64: 128, 16>}, {pipeline_mode = #tpu.pipeline_mode<synchronous>, transform_indices = @transform_3, window_bounds = array<i64: 128, 16>}, {pipeline_mode = #tpu.pipeline_mode<synchronous>, transform_indices = @transform_4, window_bounds = array<i64: 16, 128>}, {pipeline_mode = #tpu.pipeline_mode<synchronous>, transform_indices = @transform_5, window_bounds = array<i64: 32, 32>}, {pipeline_mode = #tpu.pipeline_mode<synchronous>, transform_indices = @transform_6, window_bounds = array<i64: 2, 32, 96>}, {pipeline_mode = #tpu.pipeline_mode<synchronous>, transform_indices = @transform_7, window_bounds = array<i64: 2, 1, 96>}, {pipeline_mode = #tpu.pipeline_mode<synchronous>, transform_indices = @transform_8, window_bounds = array<i64: 2, 32, 32>}, {pipeline_mode = #tpu.pipeline_mode<synchronous>, transform_indices = @transform_9, window_bounds = array<i64: 2, 32, 128>}, {pipeline_mode = #tpu.pipeline_mode<synchronous>, transform_indices = @transform_10, window_bounds = array<i64: 2, 1, 128>}, {pipeline_mode = #tpu.pipeline_mode<synchronous>, transform_indices = @transform_11, window_bounds = array<i64: 2, 128, 32>}, {pipeline_mode = #tpu.pipeline_mode<synchronous>, transform_indices = @transform_12, window_bounds = array<i64: 2, 6, 32>}, {pipeline_mode = #tpu.pipeline_mode<synchronous>, transform_indices = @transform_13, window_bounds = array<i64: 2, 32>}, {pipeline_mode = #tpu.pipeline_mode<synchronous>, transform_indices = @transform_14, window_bounds = array<i64: 32, 128>}, {pipeline_mode = #tpu.pipeline_mode<synchronous>, transform_indices = @transform_15, window_bounds = array<i64: 1, 128>}, {transform_indices = @transform_16, window_bounds = array<i64: 16, 128>}]} {
    %c0 = arith.constant 0 : index
    %c0_0 = arith.constant 0 : index
    %0 = vector.load %arg1[%c0, %c0_0] : memref<16x32xf32, #tpu.memory_space<vmem>>, vector<16x32xf32>
    %c0_1 = arith.constant 0 : index
    %c0_2 = arith.constant 0 : index
    %1 = vector.load %arg3[%c0_1, %c0_2] : memref<128x16xf32, #tpu.memory_space<vmem>>, vector<128x16xf32>
    %c0_3 = arith.constant 0 : index
    %c0_4 = arith.constant 0 : index
    %2 = vector.load %arg4[%c0_3, %c0_4] : memref<128x16xf32, #tpu.memory_space<vmem>>, vector<128x16xf32>
    %c0_5 = arith.constant 0 : index
    %c0_6 = arith.constant 0 : index
    %3 = vector.load %arg5[%c0_5, %c0_6] : memref<16x128xf32, #tpu.memory_space<vmem>>, vector<16x128xf32>
    %c0_7 = arith.constant 0 : index
    %c0_8 = arith.constant 0 : index
    %4 = vector.load %arg6[%c0_7, %c0_8] : memref<32x32xf32, #tpu.memory_space<vmem>>, vector<32x32xf32>
    %c0_9 = arith.constant 0 : index
    %c0_10 = arith.constant 0 : index
    %c0_11 = arith.constant 0 : index
    %5 = vector.load %arg13[%c0_9, %c0_10, %c0_11] : memref<2x6x32xf32, #tpu.memory_space<vmem>>, vector<1x6x32xf32>
    %6 = vector.shape_cast %5 : vector<1x6x32xf32> to vector<6x32xf32>
    %7 = vector.extract_strided_slice %6 {offsets = [0, 0], sizes = [1, 32], strides = [1, 1]} : vector<6x32xf32> to vector<1x32xf32>
    %8 = vector.extract_strided_slice %6 {offsets = [1, 0], sizes = [1, 32], strides = [1, 1]} : vector<6x32xf32> to vector<1x32xf32>
    %cst = arith.constant dense<0.000000e+00> : vector<16xf32>
    %9 = vector.multi_reduction <add>, %0, %cst [1] : vector<16x32xf32> to vector<16xf32>
    %10 = vector.shape_cast %9 : vector<16xf32> to vector<16x1xf32>
    %cst_12 = arith.constant 3.200000e+01 : f32
    %11 = vector.broadcast %cst_12 : f32 to vector<16x1xf32>
    %12 = arith.divf %10, %11 : vector<16x1xf32>
    %13 = vector.broadcast %12 : vector<16x1xf32> to vector<16x32xf32>
    %14 = arith.subf %0, %13 : vector<16x32xf32>
    %15 = arith.mulf %14, %14 : vector<16x32xf32>
    %cst_13 = arith.constant dense<0.000000e+00> : vector<16xf32>
    %16 = vector.multi_reduction <add>, %15, %cst_13 [1] : vector<16x32xf32> to vector<16xf32>
    %17 = vector.shape_cast %16 : vector<16xf32> to vector<16x1xf32>
    %cst_14 = arith.constant 3.200000e+01 : f32
    %18 = vector.broadcast %cst_14 : f32 to vector<16x1xf32>
    %19 = arith.divf %17, %18 : vector<16x1xf32>
    %cst_15 = arith.constant 9.99999974E-6 : f32
    %20 = vector.broadcast %cst_15 : f32 to vector<16x1xf32>
    %21 = arith.addf %19, %20 : vector<16x1xf32>
    %22 = math.rsqrt %21 : vector<16x1xf32>
    %23 = vector.broadcast %22 : vector<16x1xf32> to vector<16x32xf32>
    %24 = arith.mulf %14, %23 : vector<16x32xf32>
    %25 = vector.broadcast %7 : vector<1x32xf32> to vector<16x32xf32>
    %26 = arith.mulf %24, %25 : vector<16x32xf32>
    %27 = vector.broadcast %8 : vector<1x32xf32> to vector<16x32xf32>
    %28 = arith.addf %26, %27 : vector<16x32xf32>
    %29 = arith.truncf %28 : vector<16x32xf32> to vector<16x32xbf16>
    %c0_16 = arith.constant 0 : index
    %c0_17 = arith.constant 0 : index
    %c0_18 = arith.constant 0 : index
    %30 = vector.load %arg7[%c0_16, %c0_17, %c0_18] : memref<2x32x96xbf16, #tpu.memory_space<vmem>>, vector<1x32x96xbf16>
    %31 = vector.shape_cast %30 : vector<1x32x96xbf16> to vector<32x96xbf16>
    %cst_19 = arith.constant dense<0.000000e+00> : vector<16x96xf32>
    %32 = tpu.matmul %29, %31, %cst_19 {dimension_numbers = #tpu.dot_dimension_numbers<[1], [0], [0], [1], [0, 0, 1, 1], [], []>} : vector<16x32xbf16>, vector<32x96xbf16>, vector<16x96xf32> -> vector<16x96xf32>
    %c0_20 = arith.constant 0 : index
    %c0_21 = arith.constant 0 : index
    %c0_22 = arith.constant 0 : index
    %33 = vector.load %arg8[%c0_20, %c0_21, %c0_22] : memref<2x1x96xf32, #tpu.memory_space<vmem>>, vector<1x1x96xf32>
    %34 = vector.shape_cast %33 : vector<1x1x96xf32> to vector<1x96xf32>
    %35 = vector.broadcast %34 : vector<1x96xf32> to vector<16x96xf32>
    %36 = arith.addf %32, %35 : vector<16x96xf32>
    %37 = vector.extract_strided_slice %36 {offsets = [0, 0], sizes = [16, 32], strides = [1, 1]} : vector<16x96xf32> to vector<16x32xf32>
    %38 = vector.extract_strided_slice %36 {offsets = [0, 32], sizes = [16, 64], strides = [1, 1]} : vector<16x96xf32> to vector<16x64xf32>
    %cst_23 = arith.constant dense<0.000000e+00> : vector<128x32xf32>
    %39 = tpu.matmul %1, %37, %cst_23 {dimension_numbers = #tpu.dot_dimension_numbers<[1], [0], [0], [1], [0, 0, 1, 1], [], []>} : vector<128x16xf32>, vector<16x32xf32>, vector<128x32xf32> -> vector<128x32xf32>
    %cst_24 = arith.constant dense<0.000000e+00> : vector<128x64xf32>
    %40 = tpu.matmul %2, %38, %cst_24 {dimension_numbers = #tpu.dot_dimension_numbers<[1], [0], [0], [1], [0, 0, 1, 1], [], []>} : vector<128x16xf32>, vector<16x64xf32>, vector<128x64xf32> -> vector<128x64xf32>
    %41 = vector.extract_strided_slice %40 {offsets = [0, 0], sizes = [128, 32], strides = [1, 1]} : vector<128x64xf32> to vector<128x32xf32>
    %42 = vector.extract_strided_slice %40 {offsets = [0, 32], sizes = [128, 32], strides = [1, 1]} : vector<128x64xf32> to vector<128x32xf32>
    %43 = arith.mulf %39, %41 : vector<128x32xf32>
    %cst_25 = arith.constant dense<0.000000e+00> : vector<128x32xf32>
    %44 = tpu.matmul %43, %4, %cst_25 {dimension_numbers = #tpu.dot_dimension_numbers<[1], [0], [0], [1], [0, 0, 1, 1], [], []>} : vector<128x32xf32>, vector<32x32xf32>, vector<128x32xf32> -> vector<128x32xf32>
    %c0_26 = arith.constant 0 : index
    %c0_27 = arith.constant 0 : index
    %c0_28 = arith.constant 0 : index
    %45 = vector.load %arg2[%c0_26, %c0_27, %c0_28] : memref<2x128x32xf32, #tpu.memory_space<vmem>>, vector<1x128x32xf32>
    %46 = vector.shape_cast %45 : vector<1x128x32xf32> to vector<128x32xf32>
    %47 = arith.addf %44, %46 : vector<128x32xf32>
    %48 = vector.shape_cast %47 : vector<128x32xf32> to vector<16x8x32xf32>
    %cst_29 = arith.constant dense<0xFF800000> : vector<16x32xf32>
    %49 = vector.multi_reduction <maximumf>, %48, %cst_29 [1] : vector<16x8x32xf32> to vector<16x32xf32>
    %50 = vector.shape_cast %49 : vector<16x32xf32> to vector<16x1x32xf32>
    %51 = vector.broadcast %50 : vector<16x1x32xf32> to vector<16x8x32xf32>
    %52 = arith.subf %48, %51 : vector<16x8x32xf32>
    %53 = math.exp %52 : vector<16x8x32xf32>
    %54 = vector.shape_cast %53 : vector<16x8x32xf32> to vector<128x32xf32>
    %55 = arith.mulf %54, %42 : vector<128x32xf32>
    %56 = tpu.concatenate %55, %54 in 1 : vector<128x32xf32>, vector<128x32xf32> -> vector<128x64xf32>
    %cst_30 = arith.constant dense<0.000000e+00> : vector<16x64xf32>
    %57 = tpu.matmul %3, %56, %cst_30 {dimension_numbers = #tpu.dot_dimension_numbers<[1], [0], [0], [1], [0, 0, 1, 1], [], []>} : vector<16x128xf32>, vector<128x64xf32>, vector<16x64xf32> -> vector<16x64xf32>
    %58 = vector.extract_strided_slice %57 {offsets = [0, 0], sizes = [16, 32], strides = [1, 1]} : vector<16x64xf32> to vector<16x32xf32>
    %59 = vector.extract_strided_slice %57 {offsets = [0, 32], sizes = [16, 32], strides = [1, 1]} : vector<16x64xf32> to vector<16x32xf32>
    %60 = tpu.reciprocal %59 {approx = true} : vector<16x32xf32> -> vector<16x32xf32>
    %61 = arith.mulf %58, %60 : vector<16x32xf32>
    %62 = arith.truncf %61 : vector<16x32xf32> to vector<16x32xbf16>
    %c0_31 = arith.constant 0 : index
    %c0_32 = arith.constant 0 : index
    %c0_33 = arith.constant 0 : index
    %63 = vector.load %arg9[%c0_31, %c0_32, %c0_33] : memref<2x32x32xbf16, #tpu.memory_space<vmem>>, vector<1x32x32xbf16>
    %64 = vector.shape_cast %63 : vector<1x32x32xbf16> to vector<32x32xbf16>
    %cst_34 = arith.constant dense<0.000000e+00> : vector<16x32xf32>
    %65 = tpu.matmul %62, %64, %cst_34 {dimension_numbers = #tpu.dot_dimension_numbers<[1], [0], [0], [1], [0, 0, 1, 1], [], []>} : vector<16x32xbf16>, vector<32x32xbf16>, vector<16x32xf32> -> vector<16x32xf32>
    %66 = vector.extract_strided_slice %6 {offsets = [4, 0], sizes = [1, 32], strides = [1, 1]} : vector<6x32xf32> to vector<1x32xf32>
    %67 = vector.broadcast %66 : vector<1x32xf32> to vector<16x32xf32>
    %68 = arith.addf %65, %67 : vector<16x32xf32>
    %69 = arith.addf %0, %68 : vector<16x32xf32>
    %70 = vector.extract_strided_slice %6 {offsets = [2, 0], sizes = [1, 32], strides = [1, 1]} : vector<6x32xf32> to vector<1x32xf32>
    %71 = vector.extract_strided_slice %6 {offsets = [3, 0], sizes = [1, 32], strides = [1, 1]} : vector<6x32xf32> to vector<1x32xf32>
    %cst_35 = arith.constant dense<0.000000e+00> : vector<16xf32>
    %72 = vector.multi_reduction <add>, %69, %cst_35 [1] : vector<16x32xf32> to vector<16xf32>
    %73 = vector.shape_cast %72 : vector<16xf32> to vector<16x1xf32>
    %cst_36 = arith.constant 3.200000e+01 : f32
    %74 = vector.broadcast %cst_36 : f32 to vector<16x1xf32>
    %75 = arith.divf %73, %74 : vector<16x1xf32>
    %76 = vector.broadcast %75 : vector<16x1xf32> to vector<16x32xf32>
    %77 = arith.subf %69, %76 : vector<16x32xf32>
    %78 = arith.mulf %77, %77 : vector<16x32xf32>
    %cst_37 = arith.constant dense<0.000000e+00> : vector<16xf32>
    %79 = vector.multi_reduction <add>, %78, %cst_37 [1] : vector<16x32xf32> to vector<16xf32>
    %80 = vector.shape_cast %79 : vector<16xf32> to vector<16x1xf32>
    %cst_38 = arith.constant 3.200000e+01 : f32
    %81 = vector.broadcast %cst_38 : f32 to vector<16x1xf32>
    %82 = arith.divf %80, %81 : vector<16x1xf32>
    %cst_39 = arith.constant 9.99999974E-6 : f32
    %83 = vector.broadcast %cst_39 : f32 to vector<16x1xf32>
    %84 = arith.addf %82, %83 : vector<16x1xf32>
    %85 = math.rsqrt %84 : vector<16x1xf32>
    %86 = vector.broadcast %85 : vector<16x1xf32> to vector<16x32xf32>
    %87 = arith.mulf %77, %86 : vector<16x32xf32>
    %88 = vector.broadcast %70 : vector<1x32xf32> to vector<16x32xf32>
    %89 = arith.mulf %87, %88 : vector<16x32xf32>
    %90 = vector.broadcast %71 : vector<1x32xf32> to vector<16x32xf32>
    %91 = arith.addf %89, %90 : vector<16x32xf32>
    %92 = arith.truncf %91 : vector<16x32xf32> to vector<16x32xbf16>
    %c0_40 = arith.constant 0 : index
    %c0_41 = arith.constant 0 : index
    %c0_42 = arith.constant 0 : index
    %93 = vector.load %arg10[%c0_40, %c0_41, %c0_42] : memref<2x32x128xbf16, #tpu.memory_space<vmem>>, vector<1x32x128xbf16>
    %94 = vector.shape_cast %93 : vector<1x32x128xbf16> to vector<32x128xbf16>
    %cst_43 = arith.constant dense<0.000000e+00> : vector<16x128xf32>
    %95 = tpu.matmul %92, %94, %cst_43 {dimension_numbers = #tpu.dot_dimension_numbers<[1], [0], [0], [1], [0, 0, 1, 1], [], []>} : vector<16x32xbf16>, vector<32x128xbf16>, vector<16x128xf32> -> vector<16x128xf32>
    %c0_44 = arith.constant 0 : index
    %c0_45 = arith.constant 0 : index
    %c0_46 = arith.constant 0 : index
    %96 = vector.load %arg11[%c0_44, %c0_45, %c0_46] : memref<2x1x128xf32, #tpu.memory_space<vmem>>, vector<1x1x128xf32>
    %97 = vector.shape_cast %96 : vector<1x1x128xf32> to vector<1x128xf32>
    %98 = vector.broadcast %97 : vector<1x128xf32> to vector<16x128xf32>
    %99 = arith.addf %95, %98 : vector<16x128xf32>
    %cst_47 = arith.constant 0.000000e+00 : f32
    %100 = vector.broadcast %cst_47 : f32 to vector<16x128xf32>
    %101 = arith.cmpf oge, %99, %100 : vector<16x128xf32>
    %cst_48 = arith.constant 0.00999999977 : f32
    %102 = vector.broadcast %cst_48 : f32 to vector<16x128xf32>
    %103 = arith.mulf %102, %99 : vector<16x128xf32>
    %104 = arith.select %101, %99, %103 : vector<16x128xi1>, vector<16x128xf32>
    %105 = arith.truncf %104 : vector<16x128xf32> to vector<16x128xbf16>
    %c0_49 = arith.constant 0 : index
    %c0_50 = arith.constant 0 : index
    %c0_51 = arith.constant 0 : index
    %106 = vector.load %arg12[%c0_49, %c0_50, %c0_51] : memref<2x128x32xbf16, #tpu.memory_space<vmem>>, vector<1x128x32xbf16>
    %107 = vector.shape_cast %106 : vector<1x128x32xbf16> to vector<128x32xbf16>
    %cst_52 = arith.constant dense<0.000000e+00> : vector<16x32xf32>
    %108 = tpu.matmul %105, %107, %cst_52 {dimension_numbers = #tpu.dot_dimension_numbers<[1], [0], [0], [1], [0, 0, 1, 1], [], []>} : vector<16x128xbf16>, vector<128x32xbf16>, vector<16x32xf32> -> vector<16x32xf32>
    %109 = vector.extract_strided_slice %6 {offsets = [5, 0], sizes = [1, 32], strides = [1, 1]} : vector<6x32xf32> to vector<1x32xf32>
    %110 = vector.broadcast %109 : vector<1x32xf32> to vector<16x32xf32>
    %111 = arith.addf %108, %110 : vector<16x32xf32>
    %112 = arith.addf %69, %111 : vector<16x32xf32>
    %c1 = arith.constant 1 : index
    %c0_53 = arith.constant 0 : index
    %c0_54 = arith.constant 0 : index
    %113 = vector.load %arg13[%c1, %c0_53, %c0_54] : memref<2x6x32xf32, #tpu.memory_space<vmem>>, vector<1x6x32xf32>
    %114 = vector.shape_cast %113 : vector<1x6x32xf32> to vector<6x32xf32>
    %115 = vector.extract_strided_slice %114 {offsets = [0, 0], sizes = [1, 32], strides = [1, 1]} : vector<6x32xf32> to vector<1x32xf32>
    %116 = vector.extract_strided_slice %114 {offsets = [1, 0], sizes = [1, 32], strides = [1, 1]} : vector<6x32xf32> to vector<1x32xf32>
    %cst_55 = arith.constant dense<0.000000e+00> : vector<16xf32>
    %117 = vector.multi_reduction <add>, %112, %cst_55 [1] : vector<16x32xf32> to vector<16xf32>
    %118 = vector.shape_cast %117 : vector<16xf32> to vector<16x1xf32>
    %cst_56 = arith.constant 3.200000e+01 : f32
    %119 = vector.broadcast %cst_56 : f32 to vector<16x1xf32>
    %120 = arith.divf %118, %119 : vector<16x1xf32>
    %121 = vector.broadcast %120 : vector<16x1xf32> to vector<16x32xf32>
    %122 = arith.subf %112, %121 : vector<16x32xf32>
    %123 = arith.mulf %122, %122 : vector<16x32xf32>
    %cst_57 = arith.constant dense<0.000000e+00> : vector<16xf32>
    %124 = vector.multi_reduction <add>, %123, %cst_57 [1] : vector<16x32xf32> to vector<16xf32>
    %125 = vector.shape_cast %124 : vector<16xf32> to vector<16x1xf32>
    %cst_58 = arith.constant 3.200000e+01 : f32
    %126 = vector.broadcast %cst_58 : f32 to vector<16x1xf32>
    %127 = arith.divf %125, %126 : vector<16x1xf32>
    %cst_59 = arith.constant 9.99999974E-6 : f32
    %128 = vector.broadcast %cst_59 : f32 to vector<16x1xf32>
    %129 = arith.addf %127, %128 : vector<16x1xf32>
    %130 = math.rsqrt %129 : vector<16x1xf32>
    %131 = vector.broadcast %130 : vector<16x1xf32> to vector<16x32xf32>
    %132 = arith.mulf %122, %131 : vector<16x32xf32>
    %133 = vector.broadcast %115 : vector<1x32xf32> to vector<16x32xf32>
    %134 = arith.mulf %132, %133 : vector<16x32xf32>
    %135 = vector.broadcast %116 : vector<1x32xf32> to vector<16x32xf32>
    %136 = arith.addf %134, %135 : vector<16x32xf32>
    %137 = arith.truncf %136 : vector<16x32xf32> to vector<16x32xbf16>
    %c1_60 = arith.constant 1 : index
    %c0_61 = arith.constant 0 : index
    %c0_62 = arith.constant 0 : index
    %138 = vector.load %arg7[%c1_60, %c0_61, %c0_62] : memref<2x32x96xbf16, #tpu.memory_space<vmem>>, vector<1x32x96xbf16>
    %139 = vector.shape_cast %138 : vector<1x32x96xbf16> to vector<32x96xbf16>
    %cst_63 = arith.constant dense<0.000000e+00> : vector<16x96xf32>
    %140 = tpu.matmul %137, %139, %cst_63 {dimension_numbers = #tpu.dot_dimension_numbers<[1], [0], [0], [1], [0, 0, 1, 1], [], []>} : vector<16x32xbf16>, vector<32x96xbf16>, vector<16x96xf32> -> vector<16x96xf32>
    %c1_64 = arith.constant 1 : index
    %c0_65 = arith.constant 0 : index
    %c0_66 = arith.constant 0 : index
    %141 = vector.load %arg8[%c1_64, %c0_65, %c0_66] : memref<2x1x96xf32, #tpu.memory_space<vmem>>, vector<1x1x96xf32>
    %142 = vector.shape_cast %141 : vector<1x1x96xf32> to vector<1x96xf32>
    %143 = vector.broadcast %142 : vector<1x96xf32> to vector<16x96xf32>
    %144 = arith.addf %140, %143 : vector<16x96xf32>
    %145 = vector.extract_strided_slice %144 {offsets = [0, 0], sizes = [16, 32], strides = [1, 1]} : vector<16x96xf32> to vector<16x32xf32>
    %146 = vector.extract_strided_slice %144 {offsets = [0, 32], sizes = [16, 64], strides = [1, 1]} : vector<16x96xf32> to vector<16x64xf32>
    %cst_67 = arith.constant dense<0.000000e+00> : vector<128x32xf32>
    %147 = tpu.matmul %1, %145, %cst_67 {dimension_numbers = #tpu.dot_dimension_numbers<[1], [0], [0], [1], [0, 0, 1, 1], [], []>} : vector<128x16xf32>, vector<16x32xf32>, vector<128x32xf32> -> vector<128x32xf32>
    %cst_68 = arith.constant dense<0.000000e+00> : vector<128x64xf32>
    %148 = tpu.matmul %2, %146, %cst_68 {dimension_numbers = #tpu.dot_dimension_numbers<[1], [0], [0], [1], [0, 0, 1, 1], [], []>} : vector<128x16xf32>, vector<16x64xf32>, vector<128x64xf32> -> vector<128x64xf32>
    %149 = vector.extract_strided_slice %148 {offsets = [0, 0], sizes = [128, 32], strides = [1, 1]} : vector<128x64xf32> to vector<128x32xf32>
    %150 = vector.extract_strided_slice %148 {offsets = [0, 32], sizes = [128, 32], strides = [1, 1]} : vector<128x64xf32> to vector<128x32xf32>
    %151 = arith.mulf %147, %149 : vector<128x32xf32>
    %cst_69 = arith.constant dense<0.000000e+00> : vector<128x32xf32>
    %152 = tpu.matmul %151, %4, %cst_69 {dimension_numbers = #tpu.dot_dimension_numbers<[1], [0], [0], [1], [0, 0, 1, 1], [], []>} : vector<128x32xf32>, vector<32x32xf32>, vector<128x32xf32> -> vector<128x32xf32>
    %c1_70 = arith.constant 1 : index
    %c0_71 = arith.constant 0 : index
    %c0_72 = arith.constant 0 : index
    %153 = vector.load %arg2[%c1_70, %c0_71, %c0_72] : memref<2x128x32xf32, #tpu.memory_space<vmem>>, vector<1x128x32xf32>
    %154 = vector.shape_cast %153 : vector<1x128x32xf32> to vector<128x32xf32>
    %155 = arith.addf %152, %154 : vector<128x32xf32>
    %156 = vector.shape_cast %155 : vector<128x32xf32> to vector<16x8x32xf32>
    %cst_73 = arith.constant dense<0xFF800000> : vector<16x32xf32>
    %157 = vector.multi_reduction <maximumf>, %156, %cst_73 [1] : vector<16x8x32xf32> to vector<16x32xf32>
    %158 = vector.shape_cast %157 : vector<16x32xf32> to vector<16x1x32xf32>
    %159 = vector.broadcast %158 : vector<16x1x32xf32> to vector<16x8x32xf32>
    %160 = arith.subf %156, %159 : vector<16x8x32xf32>
    %161 = math.exp %160 : vector<16x8x32xf32>
    %162 = vector.shape_cast %161 : vector<16x8x32xf32> to vector<128x32xf32>
    %163 = arith.mulf %162, %150 : vector<128x32xf32>
    %164 = tpu.concatenate %163, %162 in 1 : vector<128x32xf32>, vector<128x32xf32> -> vector<128x64xf32>
    %cst_74 = arith.constant dense<0.000000e+00> : vector<16x64xf32>
    %165 = tpu.matmul %3, %164, %cst_74 {dimension_numbers = #tpu.dot_dimension_numbers<[1], [0], [0], [1], [0, 0, 1, 1], [], []>} : vector<16x128xf32>, vector<128x64xf32>, vector<16x64xf32> -> vector<16x64xf32>
    %166 = vector.extract_strided_slice %165 {offsets = [0, 0], sizes = [16, 32], strides = [1, 1]} : vector<16x64xf32> to vector<16x32xf32>
    %167 = vector.extract_strided_slice %165 {offsets = [0, 32], sizes = [16, 32], strides = [1, 1]} : vector<16x64xf32> to vector<16x32xf32>
    %168 = tpu.reciprocal %167 {approx = true} : vector<16x32xf32> -> vector<16x32xf32>
    %169 = arith.mulf %166, %168 : vector<16x32xf32>
    %170 = arith.truncf %169 : vector<16x32xf32> to vector<16x32xbf16>
    %c1_75 = arith.constant 1 : index
    %c0_76 = arith.constant 0 : index
    %c0_77 = arith.constant 0 : index
    %171 = vector.load %arg9[%c1_75, %c0_76, %c0_77] : memref<2x32x32xbf16, #tpu.memory_space<vmem>>, vector<1x32x32xbf16>
    %172 = vector.shape_cast %171 : vector<1x32x32xbf16> to vector<32x32xbf16>
    %cst_78 = arith.constant dense<0.000000e+00> : vector<16x32xf32>
    %173 = tpu.matmul %170, %172, %cst_78 {dimension_numbers = #tpu.dot_dimension_numbers<[1], [0], [0], [1], [0, 0, 1, 1], [], []>} : vector<16x32xbf16>, vector<32x32xbf16>, vector<16x32xf32> -> vector<16x32xf32>
    %174 = vector.extract_strided_slice %114 {offsets = [4, 0], sizes = [1, 32], strides = [1, 1]} : vector<6x32xf32> to vector<1x32xf32>
    %175 = vector.broadcast %174 : vector<1x32xf32> to vector<16x32xf32>
    %176 = arith.addf %173, %175 : vector<16x32xf32>
    %177 = arith.addf %112, %176 : vector<16x32xf32>
    %178 = vector.extract_strided_slice %114 {offsets = [2, 0], sizes = [1, 32], strides = [1, 1]} : vector<6x32xf32> to vector<1x32xf32>
    %179 = vector.extract_strided_slice %114 {offsets = [3, 0], sizes = [1, 32], strides = [1, 1]} : vector<6x32xf32> to vector<1x32xf32>
    %cst_79 = arith.constant dense<0.000000e+00> : vector<16xf32>
    %180 = vector.multi_reduction <add>, %177, %cst_79 [1] : vector<16x32xf32> to vector<16xf32>
    %181 = vector.shape_cast %180 : vector<16xf32> to vector<16x1xf32>
    %cst_80 = arith.constant 3.200000e+01 : f32
    %182 = vector.broadcast %cst_80 : f32 to vector<16x1xf32>
    %183 = arith.divf %181, %182 : vector<16x1xf32>
    %184 = vector.broadcast %183 : vector<16x1xf32> to vector<16x32xf32>
    %185 = arith.subf %177, %184 : vector<16x32xf32>
    %186 = arith.mulf %185, %185 : vector<16x32xf32>
    %cst_81 = arith.constant dense<0.000000e+00> : vector<16xf32>
    %187 = vector.multi_reduction <add>, %186, %cst_81 [1] : vector<16x32xf32> to vector<16xf32>
    %188 = vector.shape_cast %187 : vector<16xf32> to vector<16x1xf32>
    %cst_82 = arith.constant 3.200000e+01 : f32
    %189 = vector.broadcast %cst_82 : f32 to vector<16x1xf32>
    %190 = arith.divf %188, %189 : vector<16x1xf32>
    %cst_83 = arith.constant 9.99999974E-6 : f32
    %191 = vector.broadcast %cst_83 : f32 to vector<16x1xf32>
    %192 = arith.addf %190, %191 : vector<16x1xf32>
    %193 = math.rsqrt %192 : vector<16x1xf32>
    %194 = vector.broadcast %193 : vector<16x1xf32> to vector<16x32xf32>
    %195 = arith.mulf %185, %194 : vector<16x32xf32>
    %196 = vector.broadcast %178 : vector<1x32xf32> to vector<16x32xf32>
    %197 = arith.mulf %195, %196 : vector<16x32xf32>
    %198 = vector.broadcast %179 : vector<1x32xf32> to vector<16x32xf32>
    %199 = arith.addf %197, %198 : vector<16x32xf32>
    %200 = arith.truncf %199 : vector<16x32xf32> to vector<16x32xbf16>
    %c1_84 = arith.constant 1 : index
    %c0_85 = arith.constant 0 : index
    %c0_86 = arith.constant 0 : index
    %201 = vector.load %arg10[%c1_84, %c0_85, %c0_86] : memref<2x32x128xbf16, #tpu.memory_space<vmem>>, vector<1x32x128xbf16>
    %202 = vector.shape_cast %201 : vector<1x32x128xbf16> to vector<32x128xbf16>
    %cst_87 = arith.constant dense<0.000000e+00> : vector<16x128xf32>
    %203 = tpu.matmul %200, %202, %cst_87 {dimension_numbers = #tpu.dot_dimension_numbers<[1], [0], [0], [1], [0, 0, 1, 1], [], []>} : vector<16x32xbf16>, vector<32x128xbf16>, vector<16x128xf32> -> vector<16x128xf32>
    %c1_88 = arith.constant 1 : index
    %c0_89 = arith.constant 0 : index
    %c0_90 = arith.constant 0 : index
    %204 = vector.load %arg11[%c1_88, %c0_89, %c0_90] : memref<2x1x128xf32, #tpu.memory_space<vmem>>, vector<1x1x128xf32>
    %205 = vector.shape_cast %204 : vector<1x1x128xf32> to vector<1x128xf32>
    %206 = vector.broadcast %205 : vector<1x128xf32> to vector<16x128xf32>
    %207 = arith.addf %203, %206 : vector<16x128xf32>
    %cst_91 = arith.constant 0.000000e+00 : f32
    %208 = vector.broadcast %cst_91 : f32 to vector<16x128xf32>
    %209 = arith.cmpf oge, %207, %208 : vector<16x128xf32>
    %cst_92 = arith.constant 0.00999999977 : f32
    %210 = vector.broadcast %cst_92 : f32 to vector<16x128xf32>
    %211 = arith.mulf %210, %207 : vector<16x128xf32>
    %212 = arith.select %209, %207, %211 : vector<16x128xi1>, vector<16x128xf32>
    %213 = arith.truncf %212 : vector<16x128xf32> to vector<16x128xbf16>
    %c1_93 = arith.constant 1 : index
    %c0_94 = arith.constant 0 : index
    %c0_95 = arith.constant 0 : index
    %214 = vector.load %arg12[%c1_93, %c0_94, %c0_95] : memref<2x128x32xbf16, #tpu.memory_space<vmem>>, vector<1x128x32xbf16>
    %215 = vector.shape_cast %214 : vector<1x128x32xbf16> to vector<128x32xbf16>
    %cst_96 = arith.constant dense<0.000000e+00> : vector<16x32xf32>
    %216 = tpu.matmul %213, %215, %cst_96 {dimension_numbers = #tpu.dot_dimension_numbers<[1], [0], [0], [1], [0, 0, 1, 1], [], []>} : vector<16x128xbf16>, vector<128x32xbf16>, vector<16x32xf32> -> vector<16x32xf32>
    %217 = vector.extract_strided_slice %114 {offsets = [5, 0], sizes = [1, 32], strides = [1, 1]} : vector<6x32xf32> to vector<1x32xf32>
    %218 = vector.broadcast %217 : vector<1x32xf32> to vector<16x32xf32>
    %219 = arith.addf %216, %218 : vector<16x32xf32>
    %220 = arith.addf %177, %219 : vector<16x32xf32>
    %c0_97 = arith.constant 0 : index
    %c0_98 = arith.constant 0 : index
    %221 = vector.load %arg14[%c0_97, %c0_98] : memref<2x32xf32, #tpu.memory_space<vmem>>, vector<2x32xf32>
    %222 = vector.extract_strided_slice %221 {offsets = [0, 0], sizes = [1, 32], strides = [1, 1]} : vector<2x32xf32> to vector<1x32xf32>
    %223 = vector.extract_strided_slice %221 {offsets = [1, 0], sizes = [1, 32], strides = [1, 1]} : vector<2x32xf32> to vector<1x32xf32>
    %cst_99 = arith.constant dense<0.000000e+00> : vector<16xf32>
    %224 = vector.multi_reduction <add>, %220, %cst_99 [1] : vector<16x32xf32> to vector<16xf32>
    %225 = vector.shape_cast %224 : vector<16xf32> to vector<16x1xf32>
    %cst_100 = arith.constant 3.200000e+01 : f32
    %226 = vector.broadcast %cst_100 : f32 to vector<16x1xf32>
    %227 = arith.divf %225, %226 : vector<16x1xf32>
    %228 = vector.broadcast %227 : vector<16x1xf32> to vector<16x32xf32>
    %229 = arith.subf %220, %228 : vector<16x32xf32>
    %230 = arith.mulf %229, %229 : vector<16x32xf32>
    %cst_101 = arith.constant dense<0.000000e+00> : vector<16xf32>
    %231 = vector.multi_reduction <add>, %230, %cst_101 [1] : vector<16x32xf32> to vector<16xf32>
    %232 = vector.shape_cast %231 : vector<16xf32> to vector<16x1xf32>
    %cst_102 = arith.constant 3.200000e+01 : f32
    %233 = vector.broadcast %cst_102 : f32 to vector<16x1xf32>
    %234 = arith.divf %232, %233 : vector<16x1xf32>
    %cst_103 = arith.constant 9.99999974E-6 : f32
    %235 = vector.broadcast %cst_103 : f32 to vector<16x1xf32>
    %236 = arith.addf %234, %235 : vector<16x1xf32>
    %237 = math.rsqrt %236 : vector<16x1xf32>
    %238 = vector.broadcast %237 : vector<16x1xf32> to vector<16x32xf32>
    %239 = arith.mulf %229, %238 : vector<16x32xf32>
    %240 = vector.broadcast %222 : vector<1x32xf32> to vector<16x32xf32>
    %241 = arith.mulf %239, %240 : vector<16x32xf32>
    %242 = vector.broadcast %223 : vector<1x32xf32> to vector<16x32xf32>
    %243 = arith.addf %241, %242 : vector<16x32xf32>
    %c0_104 = arith.constant 0 : index
    %c0_105 = arith.constant 0 : index
    %244 = vector.load %arg15[%c0_104, %c0_105] : memref<32x128xf32, #tpu.memory_space<vmem>>, vector<32x128xf32>
    %cst_106 = arith.constant dense<0.000000e+00> : vector<16x128xf32>
    %245 = tpu.matmul %243, %244, %cst_106 {dimension_numbers = #tpu.dot_dimension_numbers<[1], [0], [0], [1], [0, 0, 1, 1], [], []>} : vector<16x32xf32>, vector<32x128xf32>, vector<16x128xf32> -> vector<16x128xf32>
    %c0_107 = arith.constant 0 : index
    %c0_108 = arith.constant 0 : index
    %246 = vector.load %arg16[%c0_107, %c0_108] : memref<1x128xf32, #tpu.memory_space<vmem>>, vector<1x128xf32>
    %247 = vector.broadcast %246 : vector<1x128xf32> to vector<16x128xf32>
    %248 = arith.addf %245, %247 : vector<16x128xf32>
    %c0_109 = arith.constant 0 : index
    %c0_110 = arith.constant 0 : index
    %249 = vector.load %arg17[%c0_109, %c0_110] : memref<16x128xf32, #tpu.memory_space<vmem>>, vector<16x128xf32>
    tpu.vector_store %arg17[%c0_109, %c0_110], %248 {strides = array<i32>} : memref<16x128xf32, #tpu.memory_space<vmem>>, vector<16x128xf32>,
    return
  }
  func.func @transform_0(%arg0: i32) -> (i32, i32) {
    %c0_i32 = arith.constant 0 : i32
    %c0_i32_0 = arith.constant 0 : i32
    return %arg0, %c0_i32 : i32, i32
  }
  func.func @transform_1(%arg0: i32) -> (i32, i32, i32) {
    %c0_i32 = arith.constant 0 : i32
    %c0_i32_0 = arith.constant 0 : i32
    %c0_i32_1 = arith.constant 0 : i32
    return %c0_i32, %arg0, %c0_i32_0 : i32, i32, i32
  }
  func.func @transform_2(%arg0: i32) -> (i32, i32) {
    %c0_i32 = arith.constant 0 : i32
    %c0_i32_0 = arith.constant 0 : i32
    %c0_i32_1 = arith.constant 0 : i32
    return %c0_i32, %c0_i32_0 : i32, i32
  }
  func.func @transform_3(%arg0: i32) -> (i32, i32) {
    %c0_i32 = arith.constant 0 : i32
    %c0_i32_0 = arith.constant 0 : i32
    %c0_i32_1 = arith.constant 0 : i32
    return %c0_i32, %c0_i32_0 : i32, i32
  }
  func.func @transform_4(%arg0: i32) -> (i32, i32) {
    %c0_i32 = arith.constant 0 : i32
    %c0_i32_0 = arith.constant 0 : i32
    %c0_i32_1 = arith.constant 0 : i32
    return %c0_i32, %c0_i32_0 : i32, i32
  }
  func.func @transform_5(%arg0: i32) -> (i32, i32) {
    %c0_i32 = arith.constant 0 : i32
    %c0_i32_0 = arith.constant 0 : i32
    %c0_i32_1 = arith.constant 0 : i32
    return %c0_i32, %c0_i32_0 : i32, i32
  }
  func.func @transform_6(%arg0: i32) -> (i32, i32, i32) {
    %c0_i32 = arith.constant 0 : i32
    %c0_i32_0 = arith.constant 0 : i32
    %c0_i32_1 = arith.constant 0 : i32
    %c0_i32_2 = arith.constant 0 : i32
    return %c0_i32, %c0_i32_0, %c0_i32_1 : i32, i32, i32
  }
  func.func @transform_7(%arg0: i32) -> (i32, i32, i32) {
    %c0_i32 = arith.constant 0 : i32
    %c0_i32_0 = arith.constant 0 : i32
    %c0_i32_1 = arith.constant 0 : i32
    %c0_i32_2 = arith.constant 0 : i32
    return %c0_i32, %c0_i32_0, %c0_i32_1 : i32, i32, i32
  }
  func.func @transform_8(%arg0: i32) -> (i32, i32, i32) {
    %c0_i32 = arith.constant 0 : i32
    %c0_i32_0 = arith.constant 0 : i32
    %c0_i32_1 = arith.constant 0 : i32
    %c0_i32_2 = arith.constant 0 : i32
    return %c0_i32, %c0_i32_0, %c0_i32_1 : i32, i32, i32
  }
  func.func @transform_9(%arg0: i32) -> (i32, i32, i32) {
    %c0_i32 = arith.constant 0 : i32
    %c0_i32_0 = arith.constant 0 : i32
    %c0_i32_1 = arith.constant 0 : i32
    %c0_i32_2 = arith.constant 0 : i32
    return %c0_i32, %c0_i32_0, %c0_i32_1 : i32, i32, i32
  }
  func.func @transform_10(%arg0: i32) -> (i32, i32, i32) {
    %c0_i32 = arith.constant 0 : i32
    %c0_i32_0 = arith.constant 0 : i32
    %c0_i32_1 = arith.constant 0 : i32
    %c0_i32_2 = arith.constant 0 : i32
    return %c0_i32, %c0_i32_0, %c0_i32_1 : i32, i32, i32
  }
  func.func @transform_11(%arg0: i32) -> (i32, i32, i32) {
    %c0_i32 = arith.constant 0 : i32
    %c0_i32_0 = arith.constant 0 : i32
    %c0_i32_1 = arith.constant 0 : i32
    %c0_i32_2 = arith.constant 0 : i32
    return %c0_i32, %c0_i32_0, %c0_i32_1 : i32, i32, i32
  }
  func.func @transform_12(%arg0: i32) -> (i32, i32, i32) {
    %c0_i32 = arith.constant 0 : i32
    %c0_i32_0 = arith.constant 0 : i32
    %c0_i32_1 = arith.constant 0 : i32
    %c0_i32_2 = arith.constant 0 : i32
    return %c0_i32, %c0_i32_0, %c0_i32_1 : i32, i32, i32
  }
  func.func @transform_13(%arg0: i32) -> (i32, i32) {
    %c0_i32 = arith.constant 0 : i32
    %c0_i32_0 = arith.constant 0 : i32
    %c0_i32_1 = arith.constant 0 : i32
    return %c0_i32, %c0_i32_0 : i32, i32
  }
  func.func @transform_14(%arg0: i32) -> (i32, i32) {
    %c0_i32 = arith.constant 0 : i32
    %c0_i32_0 = arith.constant 0 : i32
    %c0_i32_1 = arith.constant 0 : i32
    return %c0_i32, %c0_i32_0 : i32, i32
  }
  func.func @transform_15(%arg0: i32) -> (i32, i32) {
    %c0_i32 = arith.constant 0 : i32
    %c0_i32_0 = arith.constant 0 : i32
    %c0_i32_1 = arith.constant 0 : i32
    return %c0_i32, %c0_i32_0 : i32, i32
  }
  func.func @transform_16(%arg0: i32) -> (i32, i32) {
    %c0_i32 = arith.constant 0 : i32
    %c0_i32_0 = arith.constant 0 : i32
    return %arg0, %c0_i32 : i32, i32
  }
}

</mosaic_0001>

<bundles_post_ra>
// kernel: transformer_forward.1
= control target key start
LH: loop header
LB: loop body
LE: loop exit
PB: predicated region body
PF: predicated region fallthrough
CT: control target
= control target key end

     0   :  { %vm95_vm0 = vcmask 261120   ;;  %v4070_v15 = vmov 0.0   ;;  %vm4071_vm1 = vmmov 0   ;;  %v123_v21 = vlaneseq  ;;  %s4072_s24 = smov 96   ;;  %s4073_s29 = smov 32   ;;  %s5281_s0 = inlined_call_operand.vmem [shape: f32[16,32], index: 0, kind: input, shape index: {}]   ;;  %s5282_s6 = inlined_call_operand.vmem [shape: bf16[2,32,96], index: 6, kind: input, shape index: {}]   ;;  %s5283_s12 = inlined_call_operand.vmem [shape: f32[2,6,32], index: 12, kind: input, shape index: {}]   ;;  %s5284_s2 = inlined_call_operand.vmem [shape: f32[128,16], index: 2, kind: input, shape index: {}]   ;;  %s5285_s7 = inlined_call_operand.vmem [shape: f32[2,1,96], index: 7, kind: input, shape index: {}]   ;;  %s5286_s3 = inlined_call_operand.vmem [shape: f32[128,16], index: 3, kind: input, shape index: {}]   ;;  %s5287_s5 = inlined_call_operand.vmem [shape: f32[32,32], index: 5, kind: input, shape index: {}]   ;;  %s5288_s1 = inlined_call_operand.vmem [shape: f32[2,128,32], index: 1, kind: input, shape index: {}]   ;;  %s5289_s4 = inlined_call_operand.vmem [shape: f32[16,128], index: 4, kind: input, shape index: {}]   ;;  %s5290_s8 = inlined_call_operand.vmem [shape: bf16[2,32,32], index: 8, kind: input, shape index: {}]   ;;  %s5291_s9 = inlined_call_operand.vmem [shape: bf16[2,32,128], index: 9, kind: input, shape index: {}]   ;;  %s5292_s11 = inlined_call_operand.vmem [shape: bf16[2,128,32], index: 11, kind: input, shape index: {}]   ;;  %s5293_s10 = inlined_call_operand.vmem [shape: f32[2,1,128], index: 10, kind: input, shape index: {}]   ;;  %s5294_s14 = inlined_call_operand.vmem [shape: f32[32,128], index: 14, kind: input, shape index: {}]   ;;  %s5295_s13 = inlined_call_operand.vmem [shape: f32[2,32], index: 13, kind: input, shape index: {}]   ;;  %s5296_s15 = inlined_call_operand.vmem [shape: f32[1,128], index: 15, kind: input, shape index: {}]   ;;  %s5297_s16 = inlined_call_operand.vmem [shape: f32[16,128], index: 16, kind: output, shape index: {}]  }
   0x1   :  { %5299 = sst [smem:[#allocation2_spill]] %s5281_s0  ;;  %v3913_v14 = vld [vmem:[%s5282_s6] sm:$0xff]   ;;  %3368 = vmatprep.subr.bf16.mxu0 %v4070_v15  ;;  %v3914_v16 = vld [vmem:[%s5282_s6 + $0x8] sm:$0xff]   ;;  %3372 = vmatprep.mubr.msk.bf16.mxu0 %vm4071_vm1, %v4070_v15  ;;  %vm203_vm2 = vcmask 130048   ;;  %v58_v44 = vld [vmem:[%s5284_s2 + $0x10] sm:$0xff] }
   0x2   :  { %s5300_s23 = sld [smem:[#allocation2_spill]]  ;;  %3369 = vmatpush3.bf16.msra.mxu0 %v3913_v14  ;;  %v4179_v24 = vshrl.u32 %v123_v21, 7  ;;  %v94_v26 = vld [vmem:[%s5283_s12] sm:$0x3f]  ;;  %3383 = vmatprep.mubr.msk.f32.mxu1 %vm203_vm2, %v58_v44  ;;  %v57_v50 = vld [vmem:[%s5284_s2 + $0x8] sm:$0xff]  ;;  %v59_v52 = vld [vmem:[%s5284_s2 + $0x18] sm:$0xff] }
   0x3   :  { %3370 = vmatprep.subr.bf16.mxu0 %v4070_v15  ;;  %v56_v39 = vld [vmem:[%s5284_s2] sm:$0xff]  ;;  %v61_v54 = vld [vmem:[%s5284_s2 + $0x28] sm:$0xff]  ;;  %v62_v55 = vld [vmem:[%s5284_s2 + $0x30] sm:$0xff] }
   0x4   :  { %v4182_v25 = vsub.s32 0, %v4179_v24  ;;  %v4189_v30 = vsub.s32 1, %v4179_v24  ;;  %v2994_v40 = vld [vmem:[%s5285_s7] ss:$0 sm:$0xff]  ;;  %v63_v56 = vld [vmem:[%s5284_s2 + $0x38] sm:$0xff]  ;;  %v65_v58 = vld [vmem:[%s5284_s2 + $0x48] sm:$0xff] }
   0x5   :  { %v72_v51 = vld [vmem:[%s5286_s3] sm:$0xff]  ;;  %v66_v59 = vld [vmem:[%s5284_s2 + $0x50] sm:$0xff]  ;;  %v67_v60 = vld [vmem:[%s5284_s2 + $0x58] sm:$0xff] }
   0x6   :  { %3371 = vmatpush3.bf16.msra.mxu0 %v3914_v16  ;;  %v126_v29 = vrot.slane %v94_v26, %v4182_v25  ;;  %v132_v34 = vrot.slane %v94_v26, %v4189_v30  ;;  %v60_v53 = vld [vmem:[%s5284_s2 + $0x20] sm:$0xff]  ;;  %v69_v62 = vld [vmem:[%s5284_s2 + $0x68] sm:$0xff]  ;;  %v70_v63 = vld [vmem:[%s5284_s2 + $0x70] sm:$0xff] }
   0x7   :  { %v64_v57 = vld [vmem:[%s5284_s2 + $0x40] sm:$0xff]  ;;  %v77_v16 = vld [vmem:[%s5286_s3 + $0x28] sm:$0xff]  ;;  %v82_v21 = vld [vmem:[%s5286_s3 + $0x50] sm:$0xff] }
   0x8   :  { %v54_v0 = vld [vmem:[%s5300_s23] sm:$0xff]  ;;  %v55_v1 = vld [vmem:[%s5300_s23 + $0x8] sm:$0xff] }
   0x9   :  { %v96_v2 = vsel %vm95_vm0, %v54_v0, 0.0  ;;  %v99_v3 = vsel %vm95_vm0, %v55_v1, 0.0  ;;  %v68_v61 = vld [vmem:[%s5284_s2 + $0x60] sm:$0xff]  ;;  %v85_v26 = vld [vmem:[%s5286_s3 + $0x68] sm:$0xff] }
   0xa   :  { %97 = vadd.xlane.f32.xlu0 %v96_v2  ;;  %v76_v14 = vld [vmem:[%s5286_s3 + $0x20] sm:$0xff] }
   0xe   :  { %100 = vadd.xlane.f32.xlu0 %v99_v3  ;;  %v71_v3 = vld [vmem:[%s5284_s2 + $0x78] sm:$0xff] }
  0x97   :  { %v98_v4 = vpop.xlane.xlu0 %97 }
  0x98   :  { %v103_v5 = vmul.f32 0.03125, %v98_v4  ;;  %v92_v4 = vld [vmem:[%s5287_s5 + $0x10] sm:$0xff] }
  0x9a   :  { %v105_v6 = vsub.f32 %v54_v0, %v103_v5  ;;  %v90_v0 = vld [vmem:[%s5287_s5] sm:$0xff]  ;;  %v93_v5 = vld [vmem:[%s5287_s5 + $0x18] sm:$0xff] }
  0x9b   :  { %v101_v7 = vpop.xlane.xlu0 %100 }
  0x9c   :  { %v104_v8 = vmul.f32 0.03125, %v101_v7  ;;  %v107_v9 = vmul.f32 %v105_v6, %v105_v6 }
  0x9e   :  { %v106_v10 = vsub.f32 %v55_v1, %v104_v8  ;;  %v109_v11 = vsel %vm95_vm0, %v107_v9, 0.0  ;;  %v91_v1 = vld [vmem:[%s5287_s5 + $0x8] sm:$0xff] }
  0x9f   :  { %110 = vadd.xlane.f32.xlu1 %v109_v11  ;;  %v4266_v2 = vpack.c.bf16 %v91_v1, %v90_v0  ;;  %v73_v11 = vld [vmem:[%s5286_s3 + $0x8] sm:$0xff] }
  0xa0   :  { %v108_v12 = vmul.f32 %v106_v10, %v106_v10 }
  0xa2   :  { %v112_v13 = vsel %vm95_vm0, %v108_v12, 0.0  ;;  %v74_v12 = vld [vmem:[%s5286_s3 + $0x10] sm:$0xff] }
  0xa3   :  { %113 = vadd.xlane.f32.xlu1 %v112_v13  ;;  %v75_v13 = vld [vmem:[%s5286_s3 + $0x18] sm:$0xff] }
 0x12c   :  { %v111_v17 = vpop.xlane.xlu1 %110 }
 0x12d   :  { %v115_v18 = vmul.f32 0.03125, %v111_v17  ;;  %v78_v17 = vld [vmem:[%s5286_s3 + $0x30] sm:$0xff] }
 0x12f   :  { %v117_v19 = vadd.f32 1e-05, %v115_v18  ;;  %v79_v18 = vld [vmem:[%s5286_s3 + $0x38] sm:$0xff] }
 0x130   :  { %v114_v20 = vpop.xlane.xlu1 %113 }
 0x131   :  { %3941 = vrsqrt.f32 %v117_v19  ;;  %v116_v22 = vmul.f32 0.03125, %v114_v20  ;;  %v80_v19 = vld [vmem:[%s5286_s3 + $0x40] sm:$0xff]  ;;  %v81_v20 = vld [vmem:[%s5286_s3 + $0x48] sm:$0xff] }
 0x133   :  { %v118_v23 = vadd.f32 1e-05, %v116_v22  ;;  %v83_v22 = vld [vmem:[%s5286_s3 + $0x58] sm:$0xff] }
 0x135   :  { %3943 = vrsqrt.f32 %v118_v23  ;;  %v84_v23 = vld [vmem:[%s5286_s3 + $0x60] sm:$0xff] }
 0x13b   :  { %v3942_v27 = vpop.eup %3941 }
 0x13c   :  { %v121_v28 = vmul.f32 %v3942_v27, %v105_v6  ;;  %v4281_v6 = vpack.c.bf16 %v93_v5, %v92_v4  ;;  %v86_v27 = vld [vmem:[%s5286_s3 + $0x70] sm:$0xff] }
 0x13e   :  { %v127_v33 = vmul.f32 %v126_v29, %v121_v28  ;;  %v87_v28 = vld [vmem:[%s5286_s3 + $0x78] sm:$0xff] }
 0x13f   :  { %v3944_v31 = vpop.eup %3943 }
 0x140   :  { %v122_v32 = vmul.f32 %v3944_v31, %v106_v10  ;;  %v133_v36 = vadd.f32 %v132_v34, %v127_v33 }
 0x142   :  { %v128_v35 = vmul.f32 %v126_v29, %v122_v32 }
 0x144   :  { %v134_v37 = vadd.f32 %v132_v34, %v128_v35 }
 0x146   :  { %v135_v38 = vpack.c.bf16 %v134_v37, %v133_v36 }
 0x148   :  { %3373 = vmatmul.mubr.msk.bf16.vlgmr.msra.gmra.mrb[0].mxu0 %vm95_vm0, %v135_v38 }
 0x149   :  { %3380 = vmatprep.mubr.msk.f32.mxu0 %vm203_vm2, %v56_v39 }
 0x21b   :  { %v196_v41 = vpop.f32.mrb[0].mxu0 }
 0x21c   :  { %v3374_v42 = vpop.f32.mrb[1].mxu0  ;;  %v197_v45 = vadd.f32 %v2994_v40, %v196_v41 }
 0x21d   :  { %v199_v43 = vpop.f32.mrb[2].mxu0 }
 0x21e   :  { %v200_v46 = vadd.f32 %v2994_v40, %v199_v43  ;;  %v3375_v47 = vpop.f32.mrb[3].mxu0 }
 0x220   :  { %v3823_v48 = vpack.i.bf16 %v200_v46, %v197_v45  ;;  %v3713_v49 = vpack.c.bf16 %v200_v46, %v197_v45 }
 0x222   :  { %3824 = vrot.lane.b32.xlu0 %v3823_v48, %s4072_s24  ;;  %3714 = vmatprep.subr.bf16.mxu0 %v3713_v49 }
 0x223   :  { %3817 = vmatprep.subr.bf16.mxu1 %v3713_v49  ;;  %3716 = vmatpush3.bf16.msra.mxu0 %v3713_v49 }
 0x224   :  { %3818 = vmatpush3.bf16.msra.mxu1 %v3713_v49 }
 0x225   :  { %3722 = vmatprep.subr.bf16.mxu1 %v4266_v2 }
 0x226   :  { %3381 = vmatmul.mubr.msk.f32.vlgmr.msra.gmra.mrb[4].mxu0 %vm203_vm2, %v57_v50 }
 0x227   :  { %3408 = vmatprep.mubr.msk.f32.mxu0 %vm203_vm2, %v72_v51  ;;  %3384 = vmatmul.mubr.msk.f32.vlgmr.msra.gmra.mrb[0].mxu1 %vm203_vm2, %v59_v52 }
 0x228   :  { %3386 = vmatprep.mubr.msk.f32.mxu1 %vm203_vm2, %v60_v53  ;;  %3724 = vmatpush3.bf16.msra.mxu1 %v4266_v2 }
 0x229   :  { %3726 = vmatprep.subr.bf16.mxu1 %v4281_v6 }
 0x22b   :  { %3387 = vmatmul.mubr.msk.f32.gmra.mrb[2].mxu1 %vm203_vm2, %v61_v54 }
 0x22c   :  { %3389 = vmatprep.mubr.msk.f32.mxu1 %vm203_vm2, %v62_v55  ;;  %3728 = vmatpush3.bf16.msra.mxu1 %v4281_v6 }
 0x22d   :  { %3515 = vmatprep.subr.bf16.mxu1 %v4070_v15 }
 0x22f   :  { %3390 = vmatmul.mubr.msk.f32.gmra.mrb[4].mxu1 %vm203_vm2, %v63_v56 }
 0x230   :  { %3392 = vmatprep.mubr.msk.f32.mxu1 %vm203_vm2, %v64_v57 }
 0x233   :  { %3393 = vmatmul.mubr.msk.f32.gmra.mrb[6].mxu1 %vm203_vm2, %v65_v58 }
 0x234   :  { %3395 = vmatprep.mubr.msk.f32.mxu1 %vm203_vm2, %v66_v59 }
 0x237   :  { %3396 = vmatmul.mubr.msk.f32.gmra.mrb[8].mxu1 %vm203_vm2, %v67_v60 }
 0x238   :  { %3398 = vmatprep.mubr.msk.f32.mxu1 %vm203_vm2, %v68_v61 }
 0x23b   :  { %3399 = vmatmul.mubr.msk.f32.gmra.mrb[10].mxu1 %vm203_vm2, %v69_v62 }
 0x23c   :  { %3401 = vmatprep.mubr.msk.f32.mxu1 %vm203_vm2, %v70_v63 }
 0x23f   :  { %3402 = vmatmul.mubr.msk.f32.gmra.mrb[12].mxu1 %vm203_vm2, %v71_v3 }
 0x294   :  { %v3825_v7 = vpop.permute.xlu0 %3824 }
 0x295   :  { %v3827_v8 = vunpack.i.h.bf16 %v3825_v7  ;;  %v3826_v9 = vunpack.i.l.bf16 %v3825_v7 }
 0x297   :  { %v3717_v10 = vpack.c.bf16 %v3827_v8, %v3826_v9 }
 0x299   :  { %3718 = vmatprep.subr.bf16.mxu0 %v3717_v10 }
 0x29a   :  { %3720 = vmatpush3.bf16.msra.mxu0 %v3717_v10 }
 0x29d   :  { %3409 = vmatmul.mubr.msk.f32.vlgmr.msra.gmra.mrb[6].mxu0 %vm203_vm2, %v73_v11 }
 0x29e   :  { %3411 = vmatprep.mubr.msk.f32.mxu0 %vm203_vm2, %v74_v12 }
 0x2a1   :  { %3412 = vmatmul.mubr.msk.f32.gmra.mrb[8].mxu0 %vm203_vm2, %v75_v13 }
 0x2a2   :  { %3414 = vmatprep.mubr.msk.f32.mxu0 %vm203_vm2, %v76_v14 }
 0x2a5   :  { %3415 = vmatmul.mubr.msk.f32.gmra.mrb[10].mxu0 %vm203_vm2, %v77_v16 }
 0x2a6   :  { %3417 = vmatprep.mubr.msk.f32.mxu0 %vm203_vm2, %v78_v17  ;;  %v615_v17 = vld [vmem:[%s5288_s1 + $0x8] sm:$0xff] }
 0x2a9   :  { %3418 = vmatmul.mubr.msk.f32.gmra.mrb[12].mxu0 %vm203_vm2, %v79_v18  ;;  %v614_v18 = vld [vmem:[%s5288_s1] sm:$0xff] }
 0x2aa   :  { %3420 = vmatprep.mubr.msk.f32.mxu0 %vm203_vm2, %v80_v19 }
 0x2ad   :  { %3421 = vmatmul.mubr.msk.f32.gmra.mrb[14].mxu0 %vm203_vm2, %v81_v20 }
 0x2ae   :  { %3423 = vmatprep.mubr.msk.f32.mxu0 %vm203_vm2, %v82_v21 }
 0x2b1   :  { %3424 = vmatmul.mubr.msk.f32.gmra.mrb[16].mxu0 %vm203_vm2, %v83_v22 }
 0x2b2   :  { %3426 = vmatprep.mubr.msk.f32.mxu0 %vm203_vm2, %v84_v23  ;;  %v617_v23 = vld [vmem:[%s5288_s1 + $0x18] sm:$0xff] }
 0x2b5   :  { %3427 = vmatmul.mubr.msk.f32.gmra.mrb[18].mxu0 %vm203_vm2, %v85_v26 }
 0x2b6   :  { %3429 = vmatprep.mubr.msk.f32.mxu0 %vm203_vm2, %v86_v27  ;;  %v616_v27 = vld [vmem:[%s5288_s1 + $0x10] sm:$0xff] }
 0x2b9   :  { %3430 = vmatmul.mubr.msk.f32.gmra.mrb[20].mxu0 %vm203_vm2, %v87_v28 }
 0x2f9   :  { %v3382_v29 = vpop.f32.mrb[4].mxu0 }
 0x2fa   :  { %v318_v31 = vpop.f32.mrb[5].mxu0  ;;  %v3385_v32 = vpop.f32.mrb[0].mxu1 }
 0x2fb   :  { %v328_v33 = vpop.f32.mrb[1].mxu1 }
 0x2fe   :  { %v3388_v34 = vpop.f32.mrb[2].mxu1 }
 0x2ff   :  { %v338_v35 = vpop.f32.mrb[3].mxu1 }
 0x302   :  { %v3391_v36 = vpop.f32.mrb[4].mxu1 }
 0x303   :  { %v348_v37 = vpop.f32.mrb[5].mxu1 }
 0x306   :  { %v3394_v38 = vpop.f32.mrb[6].mxu1 }
 0x307   :  { %v358_v39 = vpop.f32.mrb[7].mxu1 }
 0x30a   :  { %v3397_v40 = vpop.f32.mrb[8].mxu1 }
 0x30b   :  { %v368_v41 = vpop.f32.mrb[9].mxu1 }
 0x30e   :  { %v3400_v42 = vpop.f32.mrb[10].mxu1 }
 0x30f   :  { %v378_v43 = vpop.f32.mrb[11].mxu1 }
 0x312   :  { %v3403_v44 = vpop.f32.mrb[12].mxu1 }
 0x313   :  { %v388_v45 = vpop.f32.mrb[13].mxu1 }
 0x370   :  { %v3410_v46 = vpop.f32.mrb[6].mxu0 }
 0x371   :  { %v599_v47 = vmul.f32 %v3410_v46, %v3382_v29  ;;  %1001 = vrot.lane.b32.xlu1 %v3410_v46, %s4072_s24  ;;  %v519_v48 = vpop.f32.mrb[7].mxu0 }
 0x372   :  { %v598_v49 = vmul.f32 %v519_v48, %v318_v31 }
 0x374   :  { %v3413_v50 = vpop.f32.mrb[8].mxu0  ;;  %3440 = vmatprep.mubr.msk.f32.mxu1 %vm95_vm0, %v598_v49 }
 0x375   :  { %v601_v51 = vmul.f32 %v3413_v50, %v3385_v32  ;;  %999 = vrot.lane.b32.xlu1 %v519_v48, %s4072_s24  ;;  %v529_v52 = vpop.f32.mrb[9].mxu0  ;;  %3441 = vmatmul.mubr.msk.f32.vlgmr.msra.gmra.mrb[14].mxu1 %vm95_vm0, %v599_v47 }
 0x376   :  { %v600_v53 = vmul.f32 %v529_v52, %v328_v33  ;;  %1003 = vrot.lane.b32.xlu0 %v529_v52, %s4072_s24  ;;  %v621_v52 = vld [vmem:[%s5288_s1 + $0x38] sm:$0xff] }
 0x378   :  { %v3416_v54 = vpop.f32.mrb[10].mxu0  ;;  %3443 = vmatprep.mubr.msk.f32.mxu1 %vm95_vm0, %v600_v53 }
 0x379   :  { %v603_v55 = vmul.f32 %v3416_v54, %v3388_v34  ;;  %1005 = vrot.lane.b32.xlu1 %v3413_v50, %s4072_s24  ;;  %v539_v56 = vpop.f32.mrb[11].mxu0  ;;  %3444 = vmatmul.mubr.msk.f32.gmra.mrb[16].mxu1 %vm95_vm0, %v601_v51 }
 0x37a   :  { %v602_v57 = vmul.f32 %v539_v56, %v338_v35  ;;  %1009 = vrot.lane.b32.xlu0 %v3416_v54, %s4072_s24 }
 0x37c   :  { %v3419_v58 = vpop.f32.mrb[12].mxu0  ;;  %3446 = vmatprep.mubr.msk.f32.mxu1 %vm95_vm0, %v602_v57 }
 0x37d   :  { %v605_v59 = vmul.f32 %v3419_v58, %v3391_v36  ;;  %1007 = vrot.lane.b32.xlu1 %v539_v56, %s4072_s24  ;;  %v549_v60 = vpop.f32.mrb[13].mxu0  ;;  %3447 = vmatmul.mubr.msk.f32.gmra.mrb[18].mxu1 %vm95_vm0, %v603_v55  ;;  %v620_v56 = vld [vmem:[%s5288_s1 + $0x30] sm:$0xff] }
 0x37e   :  { %v604_v61 = vmul.f32 %v549_v60, %v348_v37  ;;  %1011 = vrot.lane.b32.xlu0 %v549_v60, %s4072_s24  ;;  %v619_v37 = vld [vmem:[%s5288_s1 + $0x28] sm:$0xff] }
 0x380   :  { %v3422_v62 = vpop.f32.mrb[14].mxu0  ;;  %3449 = vmatprep.mubr.msk.f32.mxu1 %vm95_vm0, %v604_v61 }
 0x381   :  { %v607_v63 = vmul.f32 %v3422_v62, %v3394_v38  ;;  %1013 = vrot.lane.b32.xlu1 %v3419_v58, %s4072_s24  ;;  %v4361_v0 = vpop.f32.mrb[15].mxu0  ;;  %3450 = vmatmul.mubr.msk.f32.gmra.mrb[20].mxu1 %vm95_vm0, %v605_v59 }
 0x382   :  { %v606_v1 = vmul.f32 %v4361_v0, %v358_v39  ;;  %1017 = vrot.lane.b32.xlu0 %v3422_v62, %s4072_s24 }
 0x384   :  { %v4366_v3 = vpop.f32.mrb[16].mxu0  ;;  %3452 = vmatprep.mubr.msk.f32.mxu1 %vm95_vm0, %v606_v1 }
 0x385   :  { %v609_v4 = vmul.f32 %v4366_v3, %v3397_v40  ;;  %v4370_v5 = vpop.f32.mrb[17].mxu0  ;;  %3453 = vmatmul.mubr.msk.f32.gmra.mrb[22].mxu1 %vm95_vm0, %v607_v63  ;;  %v618_v40 = vld [vmem:[%s5288_s1 + $0x20] sm:$0xff] }
 0x386   :  { %v608_v7 = vmul.f32 %v4370_v5, %v368_v41 }
 0x388   :  { %v4374_v8 = vpop.f32.mrb[18].mxu0  ;;  %3455 = vmatprep.mubr.msk.f32.mxu1 %vm95_vm0, %v608_v7 }
 0x389   :  { %v611_v9 = vmul.f32 %v4374_v8, %v3400_v42  ;;  %v4378_v10 = vpop.f32.mrb[19].mxu0  ;;  %3456 = vmatmul.mubr.msk.f32.gmra.mrb[24].mxu1 %vm95_vm0, %v609_v4 }
 0x38a   :  { %v610_v11 = vmul.f32 %v4378_v10, %v378_v43 }
 0x38c   :  { %v4382_v12 = vpop.f32.mrb[20].mxu0  ;;  %3458 = vmatprep.mubr.msk.f32.mxu1 %vm95_vm0, %v610_v11 }
 0x38d   :  { %v613_v13 = vmul.f32 %v4382_v12, %v3403_v44  ;;  %v4386_v14 = vpop.f32.mrb[21].mxu0  ;;  %3459 = vmatmul.mubr.msk.f32.gmra.mrb[26].mxu1 %vm95_vm0, %v611_v9 }
 0x38e   :  { %v612_v16 = vmul.f32 %v4386_v14, %v388_v45 }
 0x390   :  { %3461 = vmatprep.mubr.msk.f32.mxu1 %vm95_vm0, %v612_v16 }
 0x391   :  { %3462 = vmatmul.mubr.msk.f32.gmra.mrb[28].mxu1 %vm95_vm0, %v613_v13 }
 0x392   :  { %3531 = vmatprep.mubr.msk.bf16.mxu1 %vm4071_vm1, %v4070_v15 }
 0x448   :  { %v3442_v19 = vpop.f32.mrb[14].mxu1 }
 0x449   :  { %v750_v20 = vadd.f32 %v3442_v19, %v615_v17  ;;  %v744_v21 = vpop.f32.mrb[15].mxu1 }
 0x44a   :  { %v4400_v22 = vadd.f32 %v744_v21, %v614_v18 }
 0x44b   :  { %v830_v26 = vsel %vm95_vm0, %v750_v20, -inf }
 0x44c   :  { %v831_v28 = vrot.slane %v830_v26, 4  ;;  %v823_v29 = vsel %vm95_vm0, %v4400_v22, -inf  ;;  %v3445_v31 = vpop.f32.mrb[16].mxu1 }
 0x44d   :  { %v824_v32 = vrot.slane %v823_v29, 4  ;;  %v4411_v33 = vadd.f32 %v3445_v31, %v617_v23  ;;  %v754_v34 = vpop.f32.mrb[17].mxu1 }
 0x44e   :  { %v832_v35 = vmax.f32 %v830_v26, %v831_v28  ;;  %v4413_v36 = vadd.f32 %v754_v34, %v616_v27 }
 0x44f   :  { %v825_v38 = vmax.f32 %v823_v29, %v824_v32  ;;  %v844_v39 = vsel %vm95_vm0, %v4411_v33, -inf }
 0x450   :  { %v833_v41 = vrot.slane %v832_v35, 2  ;;  %v845_v42 = vrot.slane %v844_v39, 4  ;;  %v837_v43 = vsel %vm95_vm0, %v4413_v36, -inf  ;;  %v3448_v44 = vpop.f32.mrb[18].mxu1 }
 0x451   :  { %v826_v45 = vrot.slane %v825_v38, 2  ;;  %v838_v46 = vrot.slane %v837_v43, 4  ;;  %v4425_v47 = vadd.f32 %v3448_v44, %v619_v37  ;;  %v764_v48 = vpop.f32.mrb[19].mxu1 }
 0x452   :  { %v834_v49 = vmax.f32 %v832_v35, %v833_v41  ;;  %v846_v50 = vmax.f32 %v844_v39, %v845_v42  ;;  %v4427_v51 = vadd.f32 %v764_v48, %v618_v40 }
 0x453   :  { %v827_v53 = vmax.f32 %v825_v38, %v826_v45  ;;  %v839_v54 = vmax.f32 %v837_v43, %v838_v46  ;;  %v858_v55 = vsel %vm95_vm0, %v4425_v47, -inf  ;;  %v623_v45 = vld [vmem:[%s5288_s1 + $0x48] sm:$0xff] }
 0x454   :  { %v835_v57 = vrot.slane %v834_v49, 1  ;;  %v847_v58 = vrot.slane %v846_v50, 2  ;;  %v859_v59 = vrot.slane %v858_v55, 4  ;;  %v851_v60 = vsel %vm95_vm0, %v4427_v51, -inf  ;;  %v3451_v61 = vpop.f32.mrb[20].mxu1 }
 0x455   :  { %v828_v62 = vrot.slane %v827_v53, 1  ;;  %v840_v63 = vrot.slane %v839_v54, 2  ;;  %v852_v1 = vrot.slane %v851_v60, 4  ;;  %v4439_v4 = vadd.f32 %v3451_v61, %v621_v52  ;;  %v774_v7 = vpop.f32.mrb[21].mxu1 }
 0x456   :  { %v836_v9 = vmax.f32 %v834_v49, %v835_v57  ;;  %v848_v11 = vmax.f32 %v846_v50, %v847_v58  ;;  %v860_v13 = vmax.f32 %v858_v55, %v859_v59  ;;  %v4441_v16 = vadd.f32 %v774_v7, %v620_v56  ;;  %v622_v49 = vld [vmem:[%s5288_s1 + $0x40] sm:$0xff] }
 0x457   :  { %v829_v17 = vmax.f32 %v827_v53, %v828_v62  ;;  %v841_v18 = vmax.f32 %v839_v54, %v840_v63  ;;  %v853_v19 = vmax.f32 %v851_v60, %v852_v1  ;;  %v872_v21 = vsel %vm95_vm0, %v4439_v4, -inf  ;;  %v625_v63 = vld [vmem:[%s5288_s1 + $0x58] sm:$0xff] }
 0x458   :  { %v936_v23 = vsub.f32 %v750_v20, %v836_v9  ;;  %v849_v26 = vrot.slane %v848_v11, 1  ;;  %v861_v27 = vrot.slane %v860_v13, 2  ;;  %v873_v28 = vrot.slane %v872_v21, 4  ;;  %v3454_v29 = vpop.f32.mrb[22].mxu1 }
 0x459   :  { %v935_v31 = vsub.f32 %v4400_v22, %v829_v17  ;;  %v842_v32 = vrot.slane %v841_v18, 1  ;;  %v854_v34 = vrot.slane %v853_v19, 2  ;;  %v865_v35 = vsel %vm95_vm0, %v4441_v16, -inf  ;;  %v784_v37 = vpop.f32.mrb[23].mxu1 }
 0x45a   :  { %v953_v38 = vmul.f32 1.442695, %v936_v23  ;;  %v850_v39 = vmax.f32 %v848_v11, %v849_v26  ;;  %v862_v40 = vmax.f32 %v860_v13, %v861_v27  ;;  %v874_v41 = vmax.f32 %v872_v21, %v873_v28 }
 0x45b   :  { %v951_v42 = vmul.f32 1.442695, %v935_v31  ;;  %v843_v43 = vmax.f32 %v841_v18, %v842_v32  ;;  %v855_v44 = vmax.f32 %v853_v19, %v854_v34  ;;  %v866_v20 = vrot.slane %v865_v35, 4  ;;  %v624_v18 = vld [vmem:[%s5288_s1 + $0x50] sm:$0xff] }
 0x45c   :  { %3945 = vpow2.f32 %v953_v38  ;;  %v938_v22 = vsub.f32 %v4411_v33, %v850_v39  ;;  %v863_v46 = vrot.slane %v862_v40, 1  ;;  %v875_v48 = vrot.slane %v874_v41, 2  ;;  %v3457_v50 = vpop.f32.mrb[24].mxu1 }
 0x45d   :  { %3947 = vpow2.f32 %v951_v42  ;;  %v937_v52 = vsub.f32 %v4413_v36, %v843_v43  ;;  %v856_v53 = vrot.slane %v855_v44, 1  ;;  %v867_v54 = vmax.f32 %v865_v35, %v866_v20  ;;  %v794_v55 = vpop.f32.mrb[25].mxu1 }
 0x45e   :  { %v957_v56 = vmul.f32 1.442695, %v938_v22  ;;  %v864_v57 = vmax.f32 %v862_v40, %v863_v46  ;;  %v876_v58 = vmax.f32 %v874_v41, %v875_v48  ;;  %v4456_v59 = vadd.f32 %v3454_v29, %v623_v45  ;;  %v626_v41 = vld [vmem:[%s5288_s1 + $0x60] sm:$0xff] }
 0x45f   :  { %v955_v60 = vmul.f32 1.442695, %v937_v52  ;;  %v857_v33 = vmax.f32 %v855_v44, %v856_v53  ;;  %v868_v61 = vrot.slane %v867_v54, 2  ;;  %v4458_v62 = vadd.f32 %v784_v37, %v622_v49  ;;  %v629_v52 = vld [vmem:[%s5288_s1 + $0x78] sm:$0xff] }
 0x460   :  { %3949 = vpow2.f32 %v957_v56  ;;  %v940_v36 = vsub.f32 %v4425_v47, %v864_v57  ;;  %v877_v1 = vrot.slane %v876_v58, 1  ;;  %v886_v7 = vsel %vm95_vm0, %v4456_v59, -inf  ;;  %v3460_v9 = vpop.f32.mrb[26].mxu1 }
 0x461   :  { %3951 = vpow2.f32 %v955_v60  ;;  %v939_v11 = vsub.f32 %v4427_v51, %v857_v33  ;;  %v869_v13 = vmax.f32 %v867_v54, %v868_v61  ;;  %v887_v17 = vrot.slane %v886_v7, 4  ;;  %v804_v19 = vpop.f32.mrb[27].mxu1  ;;  %v627_v51 = vld [vmem:[%s5288_s1 + $0x68] sm:$0xff] }
 0x462   :  { %v961_v21 = vmul.f32 1.442695, %v940_v36  ;;  %v878_v23 = vmax.f32 %v876_v58, %v877_v1  ;;  %v879_v47 = vsel %vm95_vm0, %v4458_v62, -inf  ;;  %v4472_v26 = vadd.f32 %v3457_v50, %v625_v63 }
 0x463   :  { %v959_v27 = vmul.f32 1.442695, %v939_v11  ;;  %v870_v28 = vrot.slane %v869_v13, 1  ;;  %v888_v29 = vmax.f32 %v886_v7, %v887_v17  ;;  %v880_v31 = vrot.slane %v879_v47, 4 }
 0x464   :  { %3953 = vpow2.f32 %v961_v21  ;;  %v942_v32 = vsub.f32 %v4439_v4, %v878_v23  ;;  %v900_v34 = vsel %vm95_vm0, %v4472_v26, -inf  ;;  %v4480_v35 = vadd.f32 %v794_v55, %v624_v18  ;;  %v3463_v37 = vpop.f32.mrb[28].mxu1 }
 0x465   :  { %3955 = vpow2.f32 %v959_v27  ;;  %v871_v38 = vmax.f32 %v869_v13, %v870_v28  ;;  %v889_v39 = vrot.slane %v888_v29, 2  ;;  %v881_v40 = vmax.f32 %v879_v47, %v880_v31  ;;  %v814_v42 = vpop.f32.mrb[29].mxu1  ;;  %v628_v13 = vld [vmem:[%s5288_s1 + $0x70] sm:$0xff] }
 0x466   :  { %v4485_v43 = vpop.eup %3945  ;;  %v965_v44 = vmul.f32 1.442695, %v942_v32  ;;  %v901_v20 = vrot.slane %v900_v34, 4  ;;  %v893_v4 = vsel %vm95_vm0, %v4480_v35, -inf  ;;  %v4489_v45 = vadd.f32 %v3460_v9, %v627_v51 }
 0x467   :  { %v4491_v22 = vpop.eup %3947  ;;  %v941_v46 = vsub.f32 %v4441_v16, %v871_v38  ;;  %v890_v48 = vmax.f32 %v888_v29, %v889_v39  ;;  %v882_v49 = vrot.slane %v881_v40, 2  ;;  %v894_v50 = vrot.slane %v893_v4, 4 }
 0x468   :  { %3957 = vpow2.f32 %v965_v44  ;;  %v902_v53 = vmax.f32 %v900_v34, %v901_v20  ;;  %v914_v54 = vsel %vm95_vm0, %v4489_v45, -inf  ;;  %v4499_v55 = vadd.f32 %v804_v19, %v626_v41 }
 0x469   :  { %v963_v56 = vmul.f32 1.442695, %v941_v46  ;;  %v891_v57 = vrot.slane %v890_v48, 1  ;;  %v883_v58 = vmax.f32 %v881_v40, %v882_v49  ;;  %v895_v60 = vmax.f32 %v893_v4, %v894_v50 }
 0x46a   :  { %v4501_v33 = vpop.eup %3949  ;;  %v903_v16 = vrot.slane %v902_v53, 2  ;;  %v915_v61 = vrot.slane %v914_v54, 4  ;;  %v907_v63 = vsel %vm95_vm0, %v4499_v55, -inf  ;;  %v4505_v36 = vadd.f32 %v3463_v37, %v629_v52 }
 0x46b   :  { %v4507_v1 = vpop.eup %3951  ;;  %3959 = vpow2.f32 %v963_v56  ;;  %v892_v7 = vmax.f32 %v890_v48, %v891_v57  ;;  %v884_v9 = vrot.slane %v883_v58, 1  ;;  %v896_v11 = vrot.slane %v895_v60, 2 }
 0x46c   :  { %v904_v17 = vmax.f32 %v902_v53, %v903_v16  ;;  %v916_v18 = vmax.f32 %v914_v54, %v915_v61  ;;  %v908_v19 = vrot.slane %v907_v63, 4  ;;  %v928_v21 = vsel %vm95_vm0, %v4505_v36, -inf }
 0x46d   :  { %v944_v23 = vsub.f32 %v4456_v59, %v892_v7  ;;  %v885_v47 = vmax.f32 %v883_v58, %v884_v9  ;;  %v897_v27 = vmax.f32 %v895_v60, %v896_v11  ;;  %v929_v28 = vrot.slane %v928_v21, 4 }
 0x46e   :  { %v4515_v29 = vpop.eup %3953  ;;  %v905_v31 = vrot.slane %v904_v17, 1  ;;  %v917_v51 = vrot.slane %v916_v18, 2  ;;  %v909_v32 = vmax.f32 %v907_v63, %v908_v19  ;;  %v815_v34 = vadd.f32 %v814_v42, %v628_v13 }
 0x46f   :  { %v4517_v37 = vpop.eup %3955  ;;  %v969_v38 = vmul.f32 1.442695, %v944_v23  ;;  %v943_v39 = vsub.f32 %v4458_v62, %v885_v47  ;;  %v898_v40 = vrot.slane %v897_v27, 1  ;;  %v930_v41 = vmax.f32 %v928_v21, %v929_v28 }
 0x470   :  { %v906_v44 = vmax.f32 %v904_v17, %v905_v31  ;;  %v918_v20 = vmax.f32 %v916_v18, %v917_v51  ;;  %v910_v4 = vrot.slane %v909_v32, 2  ;;  %v921_v59 = vsel %vm95_vm0, %v815_v34, -inf }
 0x471   :  { %3961 = vpow2.f32 %v969_v38  ;;  %v967_v46 = vmul.f32 1.442695, %v943_v39  ;;  %v899_v48 = vmax.f32 %v897_v27, %v898_v40  ;;  %v931_v49 = vrot.slane %v930_v41, 2 }
 0x472   :  { %v4521_v50 = vpop.eup %3957  ;;  %v946_v42 = vsub.f32 %v4472_v26, %v906_v44  ;;  %v919_v52 = vrot.slane %v918_v20, 1  ;;  %v911_v53 = vmax.f32 %v909_v32, %v910_v4  ;;  %v922_v54 = vrot.slane %v921_v59, 4 }
 0x473   :  { %3963 = vpow2.f32 %v967_v46  ;;  %v945_v62 = vsub.f32 %v4480_v35, %v899_v48  ;;  %v932_v56 = vmax.f32 %v930_v41, %v931_v49  ;;  %v3828_v57 = vpack.i.bf16 %v4485_v43, %v4491_v22 }
 0x474   :  { %v973_v58 = vmul.f32 1.442695, %v946_v42  ;;  %v920_v60 = vmax.f32 %v918_v20, %v919_v52  ;;  %v912_v16 = vrot.slane %v911_v53, 1  ;;  %v923_v61 = vmax.f32 %v921_v59, %v922_v54  ;;  %v1004_v59 = vpop.permute.xlu0 %1003 }
 0x475   :  { %v4527_v63 = vpop.eup %3959  ;;  %v971_v7 = vmul.f32 1.442695, %v945_v62  ;;  %v933_v9 = vrot.slane %v932_v56, 1  ;;  %3829 = vrot.lane.b32.xlu1 %v3828_v57, %s4073_s29  ;;  %v3833_v26 = vpack.i.bf16 %v4501_v33, %v4507_v1  ;;  %v3838_v35 = vpack.i.bf16 %v4515_v29, %v4517_v37 }
 0x476   :  { %3965 = vpow2.f32 %v973_v58  ;;  %v948_v11 = vsub.f32 %v4489_v45, %v920_v60  ;;  %v913_v13 = vmax.f32 %v911_v53, %v912_v16  ;;  %v924_v17 = vrot.slane %v923_v61, 2 }
 0x477   :  { %3967 = vpow2.f32 %v971_v7  ;;  %v934_v18 = vmax.f32 %v932_v56, %v933_v9  ;;  %3834 = vrot.lane.b32.xlu0 %v3833_v26, %s4073_s29  ;;  %v3843_v19 = vpack.i.bf16 %v4521_v50, %v4527_v63  ;;  %v1049_v16 = vmul.f32 %v4507_v1, %v1004_v59 }
 0x478   :  { %v977_v21 = vmul.f32 1.442695, %v948_v11  ;;  %v947_v23 = vsub.f32 %v4499_v55, %v913_v13  ;;  %v925_v47 = vmax.f32 %v923_v61, %v924_v17  ;;  %v1010_v48 = vpop.permute.xlu0 %1009 }
 0x479   :  { %v950_v27 = vsub.f32 %v4505_v36, %v934_v18  ;;  %1015 = vrot.lane.b32.xlu1 %v4361_v0, %s4072_s24 }
 0x47a   :  { %v975_v28 = vmul.f32 1.442695, %v947_v23  ;;  %v926_v45 = vrot.slane %v925_v47, 1  ;;  %3969 = vpow2.f32 %v977_v21  ;;  %v1052_v21 = vmul.f32 %v4515_v29, %v1010_v48 }
 0x47b   :  { %v4542_v31 = vpop.eup %3961  ;;  %1019 = vrot.lane.b32.xlu0 %v4370_v5, %s4072_s24  ;;  %v981_v51 = vmul.f32 1.442695, %v950_v27 }
 0x47c   :  { %3971 = vpow2.f32 %v975_v28  ;;  %v927_v32 = vmax.f32 %v925_v47, %v926_v45  ;;  %v1012_v42 = vpop.permute.xlu0 %1011 }
 0x47d   :  { %v4546_v38 = vpop.eup %3963  ;;  %3839 = vrot.lane.b32.xlu1 %v3838_v35, %s4073_s29  ;;  %3973 = vpow2.f32 %v981_v51  ;;  %v1053_v47 = vmul.f32 %v4527_v63, %v1012_v42 }
 0x47e   :  { %v949_v55 = vsub.f32 %v815_v34, %v927_v32  ;;  %v3848_v5 = vpack.i.bf16 %v4542_v31, %v4546_v38 }
 0x47f   :  { %3844 = vrot.lane.b32.xlu0 %v3843_v19, %s4073_s29 }
 0x480   :  { %v4550_v36 = vpop.eup %3965  ;;  %v979_v0 = vmul.f32 1.442695, %v949_v55  ;;  %v1018_v53 = vpop.permute.xlu0 %1017 }
 0x481   :  { %v4552_v39 = vpop.eup %3967  ;;  %1021 = vrot.lane.b32.xlu1 %v4366_v3, %s4072_s24 }
 0x482   :  { %3975 = vpow2.f32 %v979_v0  ;;  %v3853_v34 = vpack.i.bf16 %v4550_v36, %v4552_v39 }
 0x483   :  { %1025 = vrot.lane.b32.xlu0 %v4374_v8, %s4072_s24  ;;  %v4579_v8 = vld [vmem:[%s5289_s4] sm:$0xff] }
 0x484   :  { %v4562_v40 = vpop.eup %3969  ;;  %3496 = vmatprep.mubr.f32.mxu0 %v4579_v8 }
 0x485   :  { %3849 = vrot.lane.b32.xlu1 %v3848_v5, %s4073_s29 }
 0x486   :  { %v4565_v41 = vpop.eup %3971 }
 0x487   :  { %3854 = vrot.lane.b32.xlu0 %v3853_v34, %s4073_s29  ;;  %v3858_v3 = vpack.i.bf16 %v4562_v40, %v4565_v41  ;;  %v4572_v44 = vpop.eup %3973 }
 0x489   :  { %1023 = vrot.lane.b32.xlu1 %v4378_v10, %s4072_s24 }
 0x48b   :  { %1027 = vrot.lane.b32.xlu0 %v4386_v14, %s4072_s24  ;;  %v1002_v14 = vpop.permute.xlu1 %1001 }
 0x48c   :  { %v4581_v20 = vpop.eup %3975  ;;  %v1048_v58 = vmul.f32 %v4485_v43, %v1002_v14  ;;  %v1056_v14 = vmul.f32 %v4542_v31, %v1018_v53 }
 0x48d   :  { %3859 = vrot.lane.b32.xlu1 %v3858_v3, %s4073_s29  ;;  %v3863_v10 = vpack.i.bf16 %v4572_v44, %v4581_v20 }
 0x48f   :  { %3864 = vrot.lane.b32.xlu0 %v3863_v10, %s4073_s29  ;;  %v1000_v4 = vpop.permute.xlu1 %999 }
 0x490   :  { %v1047_v57 = vmul.f32 %v4491_v22, %v1000_v4 }
 0x491   :  { %1029 = vrot.lane.b32.xlu1 %v4382_v12, %s4072_s24 }
 0x493   :  { %v1006_v46 = vpop.permute.xlu1 %1005 }
 0x494   :  { %v1050_v12 = vmul.f32 %v4501_v33, %v1006_v46 }
 0x497   :  { %v1008_v49 = vpop.permute.xlu1 %1007 }
 0x498   :  { %v1051_v19 = vmul.f32 %v4517_v37, %v1008_v49 }
 0x49b   :  { %v1014_v52 = vpop.permute.xlu1 %1013 }
 0x49c   :  { %v1054_v27 = vmul.f32 %v4521_v50, %v1014_v52 }
 0x4e7   :  { %v3830_v54 = vpop.permute.xlu1 %3829 }
 0x4e8   :  { %v3832_v62 = vunpack.i.h.bf16 %v3830_v54  ;;  %v3831_v56 = vunpack.i.l.bf16 %v3830_v54 }
 0x4e9   :  { %v3835_v60 = vpop.permute.xlu0 %3834 }
 0x4ea   :  { %v3837_v61 = vunpack.i.h.bf16 %v3835_v60  ;;  %v3836_v7 = vunpack.i.l.bf16 %v3835_v60  ;;  %v1127_v9 = vsel %vm95_vm0, %v1047_v57, %v3831_v56  ;;  %v1128_v26 = vsel %vm95_vm0, %v1048_v58, %v3832_v62 }
 0x4eb   :  { %v1016_v35 = vpop.permute.xlu1 %1015  ;;  %v3729_v11 = vpack.c.bf16 %v1128_v26, %v1127_v9 }
 0x4ec   :  { %v1129_v13 = vsel %vm95_vm0, %v1049_v16, %v3836_v7  ;;  %v1130_v17 = vsel %vm95_vm0, %v1050_v12, %v3837_v61  ;;  %v1055_v50 = vmul.f32 %v4546_v38, %v1016_v35 }
 0x4ed   :  { %3730 = vmatprep.subr.bf16.mxu0 %v3729_v11  ;;  %v1020_v22 = vpop.permute.xlu0 %1019  ;;  %v3733_v43 = vpack.c.bf16 %v1130_v17, %v1129_v13 }
 0x4ee   :  { %3732 = vmatpush3.bf16.msra.mxu0 %v3729_v11  ;;  %v1057_v4 = vmul.f32 %v4552_v39, %v1020_v22 }
 0x4ef   :  { %v3840_v18 = vpop.permute.xlu1 %3839  ;;  %3734 = vmatprep.subr.bf16.mxu0 %v3733_v43 }
 0x4f0   :  { %v3842_v1 = vunpack.i.h.bf16 %v3840_v18  ;;  %v3841_v33 = vunpack.i.l.bf16 %v3840_v18  ;;  %v3916_v18 = vld [vmem:[%s5290_s8 + $0x8] sm:$0xff]  }
 0x4f1   :  { %v3845_v23 = vpop.permute.xlu0 %3844 }
 0x4f2   :  { %3736 = vmatpush3.bf16.msra.mxu0 %v3733_v43  ;;  %v3847_v28 = vunpack.i.h.bf16 %v3845_v23  ;;  %v3846_v45 = vunpack.i.l.bf16 %v3845_v23  ;;  %v1131_v51 = vsel %vm95_vm0, %v1051_v19, %v3841_v33  ;;  %v1132_v32 = vsel %vm95_vm0, %v1052_v21, %v3842_v1 }
 0x4f3   :  { %v1022_v55 = vpop.permute.xlu1 %1021  ;;  %v3737_v0 = vpack.c.bf16 %v1132_v32, %v1131_v51 }
 0x4f4   :  { %v1133_v5 = vsel %vm95_vm0, %v1053_v47, %v3846_v45  ;;  %v1134_v37 = vsel %vm95_vm0, %v1054_v27, %v3847_v28  ;;  %v1058_v59 = vmul.f32 %v4550_v36, %v1022_v55  ;;  %v1237_v28 = vsub.s32 4, %v4179_v24  ;;  %v4645_v45 = vld [vmem:[%s5283_s12] sm:$0x3f] }
 0x4f5   :  { %3738 = vmatprep.subr.bf16.mxu0 %v3737_v0  ;;  %v1026_v29 = vpop.permute.xlu0 %1025  ;;  %v3741_v34 = vpack.c.bf16 %v1134_v37, %v1133_v5  ;;  %v4034_v37 = vld [vmem:[%s5300_s23] sm:$0xff] }
 0x4f6   :  { %3740 = vmatpush3.bf16.msra.mxu0 %v3737_v0  ;;  %v1060_v36 = vmul.f32 %v4562_v40, %v1026_v29  ;;  %v1238_v51 = vrot.slane %v4645_v45, %v1237_v28 }
 0x4f7   :  { %v3850_v63 = vpop.permute.xlu1 %3849  ;;  %3742 = vmatprep.subr.bf16.mxu0 %v3741_v34 }
 0x4f8   :  { %v3852_v3 = vunpack.i.h.bf16 %v3850_v63  ;;  %v3851_v10 = vunpack.i.l.bf16 %v3850_v63 }
 0x4f9   :  { %v3855_v46 = vpop.permute.xlu0 %3854 }
 0x4fa   :  { %3744 = vmatpush3.bf16.msra.mxu0 %v3741_v34  ;;  %v3857_v48 = vunpack.i.h.bf16 %v3855_v46  ;;  %v3856_v49 = vunpack.i.l.bf16 %v3855_v46  ;;  %v1135_v42 = vsel %vm95_vm0, %v1055_v50, %v3851_v10  ;;  %v1136_v52 = vsel %vm95_vm0, %v1056_v14, %v3852_v3  ;;  %v4035_v50 = vld [vmem:[%s5300_s23 + $0x8] sm:$0xff] }
 0x4fb   :  { %v1024_v54 = vpop.permute.xlu1 %1023  ;;  %v3745_v62 = vpack.c.bf16 %v1136_v52, %v1135_v42 }
 0x4fc   :  { %v1137_v38 = vsel %vm95_vm0, %v1057_v4, %v3856_v49  ;;  %v1138_v56 = vsel %vm95_vm0, %v1058_v59, %v3857_v48  ;;  %v1059_v57 = vmul.f32 %v4565_v41, %v1024_v54 }
 0x4fd   :  { %3746 = vmatprep.subr.bf16.mxu0 %v3745_v62  ;;  %v1028_v31 = vpop.permute.xlu0 %1027  ;;  %v3749_v53 = vpack.c.bf16 %v1138_v56, %v1137_v38  ;;  %v3917_v56 = vld [vmem:[%s5291_s9] sm:$0xff]  }
 0x4fe   :  { %3748 = vmatpush3.bf16.msra.mxu0 %v3745_v62  ;;  %v1061_v16 = vmul.f32 %v4581_v20, %v1028_v31  ;;  %v89_v20 = vld [vmem:[%s5289_s4 + $0x8] sm:$0xff] }
 0x4ff   :  { %v3860_v39 = vpop.permute.xlu1 %3859  ;;  %3750 = vmatprep.subr.bf16.mxu0 %v3749_v53  ;;  %v3918_v31 = vld [vmem:[%s5291_s9 + $0x8] sm:$0xff]  }
 0x500   :  { %v3862_v58 = vunpack.i.h.bf16 %v3860_v39  ;;  %v3861_v60 = vunpack.i.l.bf16 %v3860_v39  ;;  %v3920_v39 = vld [vmem:[%s5292_s11 + $0x8] sm:$0xff]  }
 0x501   :  { %v3865_v12 = vpop.permute.xlu0 %3864 }
 0x502   :  { %3752 = vmatpush3.bf16.msra.mxu0 %v3749_v53  ;;  %v3867_v61 = vunpack.i.h.bf16 %v3865_v12  ;;  %v3866_v7 = vunpack.i.l.bf16 %v3865_v12  ;;  %v1139_v9 = vsel %vm95_vm0, %v1059_v57, %v3861_v60  ;;  %v1140_v26 = vsel %vm95_vm0, %v1060_v36, %v3862_v58  ;;  %v3919_v53 = vld [vmem:[%s5292_s11] sm:$0xff]   ;;  %v3921_v36 = vld [vmem:[%s5292_s11 + $0x10] sm:$0xff]   ;;  %v3922_v57 = vld [vmem:[%s5292_s11 + $0x18] sm:$0xff]  }
 0x503   :  { %v1030_v35 = vpop.permute.xlu1 %1029  ;;  %v3753_v11 = vpack.c.bf16 %v1140_v26, %v1139_v9  ;;  %3516 = vmatpush3.bf16.msra.mxu1 %v3919_v53  ;;  %v3923_v58 = vld [vmem:[%s5292_s11 + $0x20] sm:$0xff]   ;;  %v3924_v60 = vld [vmem:[%s5292_s11 + $0x28] sm:$0xff]  }
 0x504   :  { %v1062_v13 = vmul.f32 %v4572_v44, %v1030_v35  ;;  %v1141_v40 = vsel %vm95_vm0, %v1061_v16, %v3866_v7  ;;  %v3915_v44 = vld [vmem:[%s5290_s8] sm:$0xff]   ;;  %3517 = vmatprep.subr.bf16.mxu1 %v4070_v15  ;;  %v1325_v35 = vsub.s32 2, %v4179_v24 }
 0x505   :  { %3754 = vmatprep.subr.bf16.mxu0 %v3753_v11 }
 0x506   :  { %3756 = vmatpush3.bf16.msra.mxu0 %v3753_v11  ;;  %v1142_v41 = vsel %vm95_vm0, %v1062_v13, %v3867_v61  ;;  %v1326_v13 = vrot.slane %v4645_v45, %v1325_v35 }
 0x507   :  { %v3757_v17 = vpack.c.bf16 %v1142_v41, %v1141_v40  ;;  %3518 = vmatpush3.bf16.msra.mxu1 %v3920_v39  ;;  %v1331_v41 = vsub.s32 3, %v4179_v24 }
 0x508   :  { %3519 = vmatprep.subr.bf16.mxu1 %v4070_v15 }
 0x509   :  { %3758 = vmatprep.subr.bf16.mxu0 %v3757_v17 }
 0x50a   :  { %3760 = vmatpush3.bf16.msra.mxu0 %v3757_v17 }
 0x50b   :  { %3499 = vmatprep.subr.bf16.mxu0 %v4070_v15  ;;  %3520 = vmatpush3.bf16.msra.mxu1 %v3921_v36 }
 0x50c   :  { %3521 = vmatprep.subr.bf16.mxu1 %v4070_v15 }
 0x50d   :  { %3497 = vmatmul.mubr.f32.vlgmr.msra.gmra.mrb[22].mxu0 %v89_v20 }
 0x50e   :  { %3503 = vmatprep.mubr.msk.bf16.mxu0 %vm4071_vm1, %v4070_v15  ;;  %3500 = vmatpush3.bf16.msra.mxu0 %v3915_v44 }
 0x50f   :  { %3501 = vmatprep.subr.bf16.mxu0 %v4070_v15  ;;  %3522 = vmatpush3.bf16.msra.mxu1 %v3922_v57 }
 0x510   :  { %3523 = vmatprep.subr.bf16.mxu1 %v4070_v15 }
 0x512   :  { %3502 = vmatpush3.bf16.msra.mxu0 %v3916_v18 }
 0x513   :  { %3507 = vmatprep.subr.bf16.mxu0 %v4070_v15  ;;  %3524 = vmatpush3.bf16.msra.mxu1 %v3923_v58 }
 0x514   :  { %3525 = vmatprep.subr.bf16.mxu1 %v4070_v15 }
 0x517   :  { %3526 = vmatpush3.bf16.msra.mxu1 %v3924_v60 }
 0x518   :  { %3527 = vmatprep.subr.bf16.mxu1 %v4070_v15 }
 0x5e0   :  { %v3498_v22 = vpop.f32.mrb[22].mxu0 }
 0x5e1   :  { %3977 = vrcp.f32 %v3498_v22  ;;  %v1209_v43 = vpop.f32.mrb[23].mxu0 }
 0x5e2   :  { %3979 = vrcp.f32 %v1209_v43 }
 0x5eb   :  { %v3978_v1 = vpop.eup %3977 }
 0x5ec   :  { %v3980_v33 = vpop.eup %3979  ;;  %1224 = vrot.lane.b32.xlu0 %v3978_v1, %s4072_s24 }
 0x5ed   :  { %1222 = vrot.lane.b32.xlu1 %v3980_v33, %s4072_s24 }
 0x65e   :  { %v1225_v19 = vpop.permute.xlu0 %1224 }
 0x65f   :  { %v1229_v21 = vmul.f32 %v3498_v22, %v1225_v19  ;;  %v1223_v23 = vpop.permute.xlu1 %1222  ;;  %v1332_v22 = vrot.slane %v4645_v45, %v1331_v41  ;;  %v3925_v19 = vld [vmem:[%s5292_s11 + $0x30] sm:$0xff]  }
 0x660   :  { %v1228_v47 = vmul.f32 %v1223_v23, %v1209_v43  ;;  %3528 = vmatpush3.bf16.msra.mxu1 %v3925_v19  ;;  %v3049_v23 = vld [vmem:[%s5293_s10] ss:$0 sm:$0xff] }
 0x661   :  { %3529 = vmatprep.subr.bf16.mxu1 %v4070_v15 }
 0x662   :  { %v1230_v27 = vpack.c.bf16 %v1229_v21, %v1228_v47  ;;  %v3926_v21 = vld [vmem:[%s5292_s11 + $0x38] sm:$0xff]  }
 0x664   :  { %3504 = vmatmul.mubr.msk.bf16.vlgmr.msra.gmra.mrb[24].mxu0 %vm95_vm0, %v1230_v27  ;;  %3530 = vmatpush3.bf16.msra.mxu1 %v3926_v21 }
 0x665   :  { %3511 = vmatprep.mubr.msk.bf16.mxu0 %vm4071_vm1, %v4070_v15  ;;  %3508 = vmatpush3.bf16.msra.mxu0 %v3917_v56 }
 0x666   :  { %3509 = vmatprep.subr.bf16.mxu0 %v4070_v15 }
 0x669   :  { %3510 = vmatpush3.bf16.msra.mxu0 %v3918_v31 }
 0x66a   :  { %3535 = vmatprep.subr.bf16.mxu0 %v4070_v15 }
 0x737   :  { %v1288_v32 = vpop.f32.mrb[24].mxu0 }
 0x738   :  { %v1289_v55 = vadd.f32 %v1288_v32, %v1238_v51  ;;  %v3505_v0 = vpop.f32.mrb[25].mxu0 }
 0x739   :  { %v1291_v5 = vpop.f32.mrb[26].mxu0 }
 0x73a   :  { %v4653_v29 = vadd.f32 %v4034_v37, %v1289_v55  ;;  %v1292_v34 = vadd.f32 %v1291_v5, %v1238_v51  ;;  %v3506_v63 = vpop.f32.mrb[27].mxu0 }
 0x73c   :  { %v4658_v3 = vadd.f32 %v4035_v50, %v1292_v34  ;;  %v1297_v10 = vsel %vm95_vm0, %v4653_v29, 0.0 }
 0x73d   :  { %1298 = vadd.xlane.f32.xlu1 %v1297_v10  ;;  %v4036_v10 = vld [vmem:[%s5284_s2] sm:$0xff] }
 0x73e   :  { %v1300_v14 = vsel %vm95_vm0, %v4658_v3, 0.0 }
 0x73f   :  { %1301 = vadd.xlane.f32.xlu0 %v1300_v14  ;;  %v1428_v14 = vsub.s32 5, %v4179_v24 }
 0x7ca   :  { %v1299_v4 = vpop.xlane.xlu1 %1298 }
 0x7cb   :  { %v1303_v59 = vmul.f32 0.03125, %v1299_v4  ;;  %v1429_v4 = vrot.slane %v4645_v45, %v1428_v14 }
 0x7cc   :  { %v1302_v46 = vpop.xlane.xlu0 %1301 }
 0x7cd   :  { %v1305_v48 = vsub.f32 %v4653_v29, %v1303_v59  ;;  %v1304_v49 = vmul.f32 0.03125, %v1302_v46 }
 0x7cf   :  { %v1306_v42 = vsub.f32 %v4658_v3, %v1304_v49  ;;  %v1307_v52 = vmul.f32 %v1305_v48, %v1305_v48 }
 0x7d1   :  { %v1309_v54 = vsel %vm95_vm0, %v1307_v52, 0.0  ;;  %v1308_v62 = vmul.f32 %v1306_v42, %v1306_v42 }
 0x7d2   :  { %1310 = vadd.xlane.f32.xlu0 %v1309_v54 }
 0x7d3   :  { %v1312_v38 = vsel %vm95_vm0, %v1308_v62, 0.0 }
 0x7d6   :  { %1313 = vadd.xlane.f32.xlu0 %v1312_v38 }
 0x85f   :  { %v1311_v16 = vpop.xlane.xlu0 %1310 }
 0x860   :  { %v1315_v12 = vmul.f32 0.03125, %v1311_v16  ;;  %v3927_v16 = vld [vmem:[%s5282_s6 + $0x10] sm:$0xff]  }
 0x862   :  { %v1317_v61 = vadd.f32 1e-05, %v1315_v12  ;;  %v3928_v12 = vld [vmem:[%s5282_s6 + $0x18] sm:$0xff]  }
 0x863   :  { %v1314_v7 = vpop.xlane.xlu0 %1313 }
 0x864   :  { %3981 = vrsqrt.f32 %v1317_v61  ;;  %v1316_v9 = vmul.f32 0.03125, %v1314_v7 }
 0x866   :  { %v1318_v26 = vadd.f32 1e-05, %v1316_v9 }
 0x868   :  { %3983 = vrsqrt.f32 %v1318_v26 }
 0x86e   :  { %v3982_v11 = vpop.eup %3981 }
 0x86f   :  { %v1321_v40 = vmul.f32 %v3982_v11, %v1305_v48 }
 0x871   :  { %v1327_v20 = vmul.f32 %v1326_v13, %v1321_v40  ;;  %v4753_v40 = vld [vmem:[%s5283_s12 + $0x8] sm:$0x3f] }
 0x872   :  { %v3984_v17 = vpop.eup %3983 }
 0x873   :  { %v1322_v44 = vmul.f32 %v3984_v17, %v1306_v42  ;;  %v1333_v18 = vadd.f32 %v1332_v22, %v1327_v20  ;;  %v1552_v17 = vrot.slane %v4753_v40, %v4182_v25 }
 0x875   :  { %v1328_v43 = vmul.f32 %v1326_v13, %v1322_v44 }
 0x877   :  { %v1334_v1 = vadd.f32 %v1332_v22, %v1328_v43 }
 0x879   :  { %v1335_v33 = vpack.c.bf16 %v1334_v1, %v1333_v18  ;;  %v1558_v1 = vrot.slane %v4753_v40, %v4189_v30 }
 0x87b   :  { %3512 = vmatmul.mubr.msk.bf16.vlgmr.msra.gmra.mrb[28].mxu0 %vm95_vm0, %v1335_v33 }
 0x87c   :  { %3539 = vmatprep.mubr.msk.bf16.mxu0 %vm4071_vm1, %v4070_v15  ;;  %3536 = vmatpush3.bf16.msra.mxu0 %v3927_v16  ;;  %v4057_v16 = vld [vmem:[%s5286_s3 + $0x28] sm:$0xff] }
 0x87d   :  { %3537 = vmatprep.subr.bf16.mxu0 %v4070_v15 }
 0x880   :  { %3538 = vmatpush3.bf16.msra.mxu0 %v3928_v12  ;;  %v4058_v12 = vld [vmem:[%s5286_s3 + $0x30] sm:$0xff] }
 0x94e   :  { %v1396_v47 = vpop.f32.mrb[28].mxu0 }
 0x94f   :  { %v1397_v27 = vadd.f32 %v3049_v23, %v1396_v47  ;;  %v3513_v51 = vpop.f32.mrb[29].mxu0  ;;  %v4037_v47 = vld [vmem:[%s5286_s3] sm:$0xff] }
 0x950   :  { %v1399_v32 = vpop.f32.mrb[30].mxu0 }
 0x951   :  { %v1405_v55 = vmul.f32 0.01, %v1397_v27  ;;  %v1400_v0 = vadd.f32 %v3049_v23, %v1399_v32  ;;  %v3514_v5 = vpop.f32.mrb[31].mxu0  ;;  %vm1403_vm3 = vcmp.ge.f32.partialorder %v1397_v27, 0.0 }
 0x953   :  { %vm1404_vm4 = vcmp.ge.f32.partialorder %v1400_v0, 0.0  ;;  %v1406_v37 = vmul.f32 0.01, %v1400_v0  ;;  %v1407_v34 = vsel %vm1403_vm3, %v1397_v27, %v1405_v55  ;;  %v3067_v27 = vld [vmem:[%s5285_s7 + $0x1] ss:$0 sm:$0xff] }
 0x955   :  { %v1408_v63 = vsel %vm1404_vm4, %v1400_v0, %v1406_v37 }
 0x956   :  { %v1409_v50 = vpack.c.bf16 %v1408_v63, %v1407_v34 }
 0x958   :  { %3532 = vmatmul.mubr.bf16.vlgmr.msra.gmra.mrb[32].mxu1 %v1409_v50  ;;  %v4038_v50 = vld [vmem:[%s5284_s2 + $0x8] sm:$0xff] }
 0x959   :  { %3547 = vmatprep.mubr.msk.f32.mxu1 %vm203_vm2, %v4036_v10  ;;  %v4039_v10 = vld [vmem:[%s5284_s2 + $0x10] sm:$0xff] }
 0xa2b   :  { %v1512_v59 = vpop.f32.mrb[32].mxu1 }
 0xa2c   :  { %v1513_v46 = vadd.f32 %v1512_v59, %v1429_v4  ;;  %v3533_v48 = vpop.f32.mrb[33].mxu1  ;;  %v4041_v59 = vld [vmem:[%s5284_s2 + $0x20] sm:$0xff] }
 0xa2d   :  { %v1515_v49 = vpop.f32.mrb[34].mxu1  ;;  %v4044_v48 = vld [vmem:[%s5284_s2 + $0x38] sm:$0xff] }
 0xa2e   :  { %v4730_v42 = vadd.f32 %v1513_v46, %v4653_v29  ;;  %v1516_v52 = vadd.f32 %v1515_v49, %v1429_v4  ;;  %v3534_v54 = vpop.f32.mrb[35].mxu1  ;;  %v4040_v4 = vld [vmem:[%s5284_s2 + $0x18] sm:$0xff]  ;;  %v4043_v46 = vld [vmem:[%s5284_s2 + $0x30] sm:$0xff]  ;;  %v4046_v49 = vld [vmem:[%s5284_s2 + $0x48] sm:$0xff] }
 0xa2f   :  { %v4048_v54 = vld [vmem:[%s5284_s2 + $0x58] sm:$0xff] }
 0xa30   :  { %v4733_v62 = vadd.f32 %v1516_v52, %v4658_v3  ;;  %v1523_v38 = vsel %vm95_vm0, %v4730_v42, 0.0  ;;  %v4047_v52 = vld [vmem:[%s5284_s2 + $0x50] sm:$0xff] }
 0xa31   :  { %1524 = vadd.xlane.f32.xlu1 %v1523_v38  ;;  %v4049_v38 = vld [vmem:[%s5284_s2 + $0x60] sm:$0xff] }
 0xa32   :  { %v1526_v56 = vsel %vm95_vm0, %v4733_v62, 0.0 }
 0xa33   :  { %1527 = vadd.xlane.f32.xlu0 %v1526_v56  ;;  %v4050_v56 = vld [vmem:[%s5284_s2 + $0x68] sm:$0xff] }
 0xabe   :  { %v1525_v45 = vpop.xlane.xlu1 %1524 }
 0xabf   :  { %v1529_v31 = vmul.f32 0.03125, %v1525_v45  ;;  %v4051_v45 = vld [vmem:[%s5284_s2 + $0x70] sm:$0xff] }
 0xac0   :  { %v1528_v53 = vpop.xlane.xlu0 %1527 }
 0xac1   :  { %v1531_v39 = vsub.f32 %v4730_v42, %v1529_v31  ;;  %v1530_v29 = vmul.f32 0.03125, %v1528_v53  ;;  %v4052_v31 = vld [vmem:[%s5284_s2 + $0x78] sm:$0xff] }
 0xac3   :  { %v1532_v36 = vsub.f32 %v4733_v62, %v1530_v29  ;;  %v1533_v57 = vmul.f32 %v1531_v39, %v1531_v39 }
 0xac5   :  { %v1535_v3 = vsel %vm95_vm0, %v1533_v57, 0.0  ;;  %v1534_v58 = vmul.f32 %v1532_v36, %v1532_v36  ;;  %v4053_v57 = vld [vmem:[%s5286_s3 + $0x8] sm:$0xff] }
 0xac6   :  { %1536 = vadd.xlane.f32.xlu1 %v1535_v3  ;;  %v4054_v3 = vld [vmem:[%s5286_s3 + $0x10] sm:$0xff] }
 0xac7   :  { %v1538_v60 = vsel %vm95_vm0, %v1534_v58, 0.0  ;;  %v4055_v58 = vld [vmem:[%s5286_s3 + $0x18] sm:$0xff] }
 0xac8   :  { %1539 = vadd.xlane.f32.xlu0 %v1538_v60  ;;  %v4056_v60 = vld [vmem:[%s5286_s3 + $0x20] sm:$0xff] }
 0xb53   :  { %v1537_v61 = vpop.xlane.xlu1 %1536 }
 0xb54   :  { %v1541_v7 = vmul.f32 0.03125, %v1537_v61  ;;  %v4059_v61 = vld [vmem:[%s5286_s3 + $0x38] sm:$0xff] }
 0xb55   :  { %v1540_v9 = vpop.xlane.xlu0 %1539 }
 0xb56   :  { %v1543_v26 = vadd.f32 1e-05, %v1541_v7  ;;  %v1542_v11 = vmul.f32 0.03125, %v1540_v9  ;;  %v4060_v7 = vld [vmem:[%s5286_s3 + $0x40] sm:$0xff]  ;;  %v4061_v9 = vld [vmem:[%s5286_s3 + $0x48] sm:$0xff] }
 0xb58   :  { %3985 = vrsqrt.f32 %v1543_v26  ;;  %v1544_v13 = vadd.f32 1e-05, %v1542_v11  ;;  %v4062_v26 = vld [vmem:[%s5286_s3 + $0x50] sm:$0xff]  ;;  %v4063_v11 = vld [vmem:[%s5286_s3 + $0x58] sm:$0xff] }
 0xb5a   :  { %3987 = vrsqrt.f32 %v1544_v13  ;;  %v4064_v13 = vld [vmem:[%s5286_s3 + $0x60] sm:$0xff] }
 0xb62   :  { %v3986_v20 = vpop.eup %3985 }
 0xb63   :  { %v1547_v44 = vmul.f32 %v3986_v20, %v1531_v39  ;;  %v4066_v20 = vld [vmem:[%s5286_s3 + $0x70] sm:$0xff] }
 0xb64   :  { %v3988_v22 = vpop.eup %3987 }
 0xb65   :  { %v1553_v43 = vmul.f32 %v1552_v17, %v1547_v44  ;;  %v1548_v18 = vmul.f32 %v3988_v22, %v1532_v36  ;;  %v4067_v44 = vld [vmem:[%s5286_s3 + $0x78] sm:$0xff] }
 0xb67   :  { %v1554_v33 = vmul.f32 %v1552_v17, %v1548_v18  ;;  %v1559_v19 = vadd.f32 %v1558_v1, %v1553_v43  ;;  %v4065_v17 = vld [vmem:[%s5286_s3 + $0x68] sm:$0xff] }
 0xb69   :  { %v1560_v21 = vadd.f32 %v1558_v1, %v1554_v33 }
 0xb6b   :  { %v1561_v23 = vpack.c.bf16 %v1560_v21, %v1559_v19 }
 0xb6d   :  { %3540 = vmatmul.mubr.msk.bf16.vlgmr.msra.gmra.mrb[32].mxu0 %vm95_vm0, %v1561_v23 }
 0xb6e   :  { %3575 = vmatprep.mubr.msk.f32.mxu0 %vm203_vm2, %v4037_v47 }
 0xc40   :  { %v1624_v51 = vpop.f32.mrb[32].mxu0 }
 0xc41   :  { %v3541_v32 = vpop.f32.mrb[33].mxu0  ;;  %v1625_v0 = vadd.f32 %v3067_v27, %v1624_v51 }
 0xc42   :  { %v1627_v55 = vpop.f32.mrb[34].mxu0 }
 0xc43   :  { %v1628_v5 = vadd.f32 %v3067_v27, %v1627_v55  ;;  %v3542_v37 = vpop.f32.mrb[35].mxu0 }
 0xc45   :  { %v3868_v34 = vpack.i.bf16 %v1628_v5, %v1625_v0  ;;  %v3761_v63 = vpack.c.bf16 %v1628_v5, %v1625_v0 }
 0xc47   :  { %3869 = vrot.lane.b32.xlu1 %v3868_v34, %s4072_s24  ;;  %3762 = vmatprep.subr.bf16.mxu1 %v3761_v63 }
 0xc48   :  { %3764 = vmatpush3.bf16.msra.mxu1 %v3761_v63 }
 0xc49   :  { %3770 = vmatprep.subr.bf16.mxu1 %v4266_v2 }
 0xc4b   :  { %3548 = vmatmul.mubr.msk.f32.vlgmr.msra.gmra.mrb[30].mxu1 %vm203_vm2, %v4038_v50 }
 0xc4c   :  { %3550 = vmatprep.mubr.msk.f32.mxu1 %vm203_vm2, %v4039_v10  ;;  %3772 = vmatpush3.bf16.msra.mxu1 %v4266_v2  ;;  %v4042_v2 = vld [vmem:[%s5284_s2 + $0x28] sm:$0xff] }
 0xc4d   :  { %3774 = vmatprep.subr.bf16.mxu1 %v4281_v6 }
 0xc4f   :  { %3551 = vmatmul.mubr.msk.f32.gmra.mrb[36].mxu1 %vm203_vm2, %v4040_v4 }
 0xc50   :  { %3553 = vmatprep.mubr.msk.f32.mxu1 %vm203_vm2, %v4041_v59  ;;  %3776 = vmatpush3.bf16.msra.mxu1 %v4281_v6  ;;  %v4045_v6 = vld [vmem:[%s5284_s2 + $0x40] sm:$0xff] }
 0xc51   :  { %3682 = vmatprep.subr.bf16.mxu1 %v4070_v15 }
 0xc53   :  { %3554 = vmatmul.mubr.msk.f32.gmra.mrb[38].mxu1 %vm203_vm2, %v4042_v2 }
 0xc54   :  { %3556 = vmatprep.mubr.msk.f32.mxu1 %vm203_vm2, %v4043_v46 }
 0xc57   :  { %3557 = vmatmul.mubr.msk.f32.gmra.mrb[40].mxu1 %vm203_vm2, %v4044_v48 }
 0xc58   :  { %3559 = vmatprep.mubr.msk.f32.mxu1 %vm203_vm2, %v4045_v6 }
 0xc5b   :  { %3560 = vmatmul.mubr.msk.f32.gmra.mrb[42].mxu1 %vm203_vm2, %v4046_v49 }
 0xc5c   :  { %3562 = vmatprep.mubr.msk.f32.mxu1 %vm203_vm2, %v4047_v52 }
 0xc5f   :  { %3563 = vmatmul.mubr.msk.f32.gmra.mrb[44].mxu1 %vm203_vm2, %v4048_v54 }
 0xc60   :  { %3565 = vmatprep.mubr.msk.f32.mxu1 %vm203_vm2, %v4049_v38 }
 0xc63   :  { %3566 = vmatmul.mubr.msk.f32.gmra.mrb[46].mxu1 %vm203_vm2, %v4050_v56 }
 0xc64   :  { %3568 = vmatprep.mubr.msk.f32.mxu1 %vm203_vm2, %v4051_v45 }
 0xc67   :  { %3569 = vmatmul.mubr.msk.f32.gmra.mrb[48].mxu1 %vm203_vm2, %v4052_v31 }
 0xcb9   :  { %v3870_v53 = vpop.permute.xlu1 %3869 }
 0xcba   :  { %v3872_v39 = vunpack.i.h.bf16 %v3870_v53  ;;  %v3871_v29 = vunpack.i.l.bf16 %v3870_v53 }
 0xcbc   :  { %v3765_v36 = vpack.c.bf16 %v3872_v39, %v3871_v29 }
 0xcbe   :  { %3766 = vmatprep.subr.bf16.mxu0 %v3765_v36 }
 0xcbf   :  { %3768 = vmatpush3.bf16.msra.mxu0 %v3765_v36 }
 0xcc2   :  { %3576 = vmatmul.mubr.msk.f32.vlgmr.msra.gmra.mrb[36].mxu0 %vm203_vm2, %v4053_v57 }
 0xcc3   :  { %3578 = vmatprep.mubr.msk.f32.mxu0 %vm203_vm2, %v4054_v3 }
 0xcc6   :  { %3579 = vmatmul.mubr.msk.f32.gmra.mrb[38].mxu0 %vm203_vm2, %v4055_v58 }
 0xcc7   :  { %3581 = vmatprep.mubr.msk.f32.mxu0 %vm203_vm2, %v4056_v60 }
 0xcca   :  { %3582 = vmatmul.mubr.msk.f32.gmra.mrb[40].mxu0 %vm203_vm2, %v4057_v16 }
 0xccb   :  { %3584 = vmatprep.mubr.msk.f32.mxu0 %vm203_vm2, %v4058_v12 }
 0xcce   :  { %3585 = vmatmul.mubr.msk.f32.gmra.mrb[42].mxu0 %vm203_vm2, %v4059_v61 }
 0xccf   :  { %3587 = vmatprep.mubr.msk.f32.mxu0 %vm203_vm2, %v4060_v7 }
 0xcd2   :  { %3588 = vmatmul.mubr.msk.f32.gmra.mrb[44].mxu0 %vm203_vm2, %v4061_v9 }
 0xcd3   :  { %3590 = vmatprep.mubr.msk.f32.mxu0 %vm203_vm2, %v4062_v26 }
 0xcd6   :  { %3591 = vmatmul.mubr.msk.f32.gmra.mrb[46].mxu0 %vm203_vm2, %v4063_v11  ;;  %v3104_v11 = vld [vmem:[%s5288_s1 + $0x88] sm:$0xff] }
 0xcd7   :  { %3593 = vmatprep.mubr.msk.f32.mxu0 %vm203_vm2, %v4064_v13  ;;  %v3103_v13 = vld [vmem:[%s5288_s1 + $0x80] sm:$0xff] }
 0xcda   :  { %3594 = vmatmul.mubr.msk.f32.gmra.mrb[48].mxu0 %vm203_vm2, %v4065_v17 }
 0xcdb   :  { %3596 = vmatprep.mubr.msk.f32.mxu0 %vm203_vm2, %v4066_v20 }
 0xcde   :  { %3597 = vmatmul.mubr.msk.f32.gmra.mrb[50].mxu0 %vm203_vm2, %v4067_v44 }
 0xcdf   :  { %3663 = vmatprep.mubr.f32.mxu0 %v4579_v8 }
 0xd1e   :  { %v3549_v22 = vpop.f32.mrb[30].mxu1 }
 0xd1f   :  { %v1697_v43 = vpop.f32.mrb[31].mxu1 }
 0xd22   :  { %v3552_v18 = vpop.f32.mrb[36].mxu1 }
 0xd23   :  { %v1707_v1 = vpop.f32.mrb[37].mxu1 }
 0xd26   :  { %v3555_v33 = vpop.f32.mrb[38].mxu1 }
 0xd27   :  { %v1717_v19 = vpop.f32.mrb[39].mxu1 }
 0xd2a   :  { %v3558_v21 = vpop.f32.mrb[40].mxu1 }
 0xd2b   :  { %v1727_v23 = vpop.f32.mrb[41].mxu1 }
 0xd2e   :  { %v3561_v47 = vpop.f32.mrb[42].mxu1 }
 0xd2f   :  { %v1737_v27 = vpop.f32.mrb[43].mxu1 }
 0xd32   :  { %v3564_v51 = vpop.f32.mrb[44].mxu1 }
 0xd33   :  { %v1747_v32 = vpop.f32.mrb[45].mxu1 }
 0xd36   :  { %v3567_v55 = vpop.f32.mrb[46].mxu1 }
 0xd37   :  { %v1757_v0 = vpop.f32.mrb[47].mxu1 }
 0xd3a   :  { %v3570_v5 = vpop.f32.mrb[48].mxu1 }
 0xd3b   :  { %v1767_v37 = vpop.f32.mrb[49].mxu1 }
 0xd95   :  { %v3577_v34 = vpop.f32.mrb[36].mxu0 }
 0xd96   :  { %v1930_v63 = vmul.f32 %v3577_v34, %v3549_v22  ;;  %v1850_v50 = vpop.f32.mrb[37].mxu0  ;;  %2333 = vrot.lane.b32.xlu1 %v3577_v34, %s4072_s24 }
 0xd97   :  { %v1929_v8 = vmul.f32 %v1850_v50, %v1697_v43  ;;  %2331 = vrot.lane.b32.xlu0 %v1850_v50, %s4072_s24  ;;  %v3106_v43 = vld [vmem:[%s5288_s1 + $0x98] sm:$0xff] }
 0xd99   :  { %v3580_v10 = vpop.f32.mrb[38].mxu0  ;;  %3607 = vmatprep.mubr.msk.f32.mxu1 %vm95_vm0, %v1929_v8 }
 0xd9a   :  { %v1932_v4 = vmul.f32 %v3580_v10, %v3552_v18  ;;  %v1860_v59 = vpop.f32.mrb[39].mxu0  ;;  %3608 = vmatmul.mubr.msk.f32.vlgmr.msra.gmra.mrb[50].mxu1 %vm95_vm0, %v1930_v63 }
 0xd9b   :  { %v1931_v2 = vmul.f32 %v1860_v59, %v1707_v1  ;;  %2337 = vrot.lane.b32.xlu0 %v3580_v10, %s4072_s24  ;;  %2335 = vrot.lane.b32.xlu1 %v1860_v59, %s4072_s24  ;;  %v3105_v1 = vld [vmem:[%s5288_s1 + $0x90] sm:$0xff] }
 0xd9d   :  { %v3583_v46 = vpop.f32.mrb[40].mxu0  ;;  %3610 = vmatprep.mubr.msk.f32.mxu1 %vm95_vm0, %v1931_v2 }
 0xd9e   :  { %v1934_v48 = vmul.f32 %v3583_v46, %v3555_v33  ;;  %v1870_v6 = vpop.f32.mrb[41].mxu0  ;;  %3611 = vmatmul.mubr.msk.f32.gmra.mrb[52].mxu1 %vm95_vm0, %v1932_v4 }
 0xd9f   :  { %v1933_v49 = vmul.f32 %v1870_v6, %v1717_v19  ;;  %2341 = vrot.lane.b32.xlu1 %v3583_v46, %s4072_s24  ;;  %2339 = vrot.lane.b32.xlu0 %v1870_v6, %s4072_s24 }
 0xda1   :  { %v3586_v52 = vpop.f32.mrb[42].mxu0  ;;  %3613 = vmatprep.mubr.msk.f32.mxu1 %vm95_vm0, %v1933_v49  ;;  %v3110_v49 = vld [vmem:[%s5288_s1 + $0xb8] sm:$0xff] }
 0xda2   :  { %v1936_v54 = vmul.f32 %v3586_v52, %v3558_v21  ;;  %v1880_v38 = vpop.f32.mrb[43].mxu0  ;;  %3614 = vmatmul.mubr.msk.f32.gmra.mrb[54].mxu1 %vm95_vm0, %v1934_v48 }
 0xda3   :  { %v1935_v56 = vmul.f32 %v1880_v38, %v1727_v23  ;;  %2345 = vrot.lane.b32.xlu0 %v3586_v52, %s4072_s24  ;;  %2343 = vrot.lane.b32.xlu1 %v1880_v38, %s4072_s24 }
 0xda5   :  { %v3589_v45 = vpop.f32.mrb[44].mxu0  ;;  %3616 = vmatprep.mubr.msk.f32.mxu1 %vm95_vm0, %v1935_v56  ;;  %v3109_v56 = vld [vmem:[%s5288_s1 + $0xb0] sm:$0xff] }
 0xda6   :  { %v1938_v31 = vmul.f32 %v3589_v45, %v3561_v47  ;;  %v1890_v53 = vpop.f32.mrb[45].mxu0  ;;  %3617 = vmatmul.mubr.msk.f32.gmra.mrb[56].mxu1 %vm95_vm0, %v1936_v54 }
 0xda7   :  { %v1937_v39 = vmul.f32 %v1890_v53, %v1737_v27  ;;  %2349 = vrot.lane.b32.xlu1 %v3589_v45, %s4072_s24  ;;  %2347 = vrot.lane.b32.xlu0 %v1890_v53, %s4072_s24 }
 0xda9   :  { %v4912_v29 = vpop.f32.mrb[46].mxu0  ;;  %3619 = vmatprep.mubr.msk.f32.mxu1 %vm95_vm0, %v1937_v39 }
 0xdaa   :  { %v1940_v36 = vmul.f32 %v4912_v29, %v3564_v51  ;;  %v4916_v57 = vpop.f32.mrb[47].mxu0  ;;  %3620 = vmatmul.mubr.msk.f32.gmra.mrb[58].mxu1 %vm95_vm0, %v1938_v31 }
 0xdab   :  { %v1939_v3 = vmul.f32 %v4916_v57, %v1747_v32 }
 0xdad   :  { %v4920_v58 = vpop.f32.mrb[48].mxu0  ;;  %3622 = vmatprep.mubr.msk.f32.mxu1 %vm95_vm0, %v1939_v3 }
 0xdae   :  { %v1942_v60 = vmul.f32 %v4920_v58, %v3567_v55  ;;  %v4924_v16 = vpop.f32.mrb[49].mxu0  ;;  %3623 = vmatmul.mubr.msk.f32.gmra.mrb[60].mxu1 %vm95_vm0, %v1940_v36  ;;  %v3108_v55 = vld [vmem:[%s5288_s1 + $0xa8] sm:$0xff] }
 0xdaf   :  { %v1941_v12 = vmul.f32 %v4924_v16, %v1757_v0 }
 0xdb1   :  { %v4928_v61 = vpop.f32.mrb[50].mxu0  ;;  %3625 = vmatprep.mubr.msk.f32.mxu1 %vm95_vm0, %v1941_v12 }
 0xdb2   :  { %v1944_v7 = vmul.f32 %v4928_v61, %v3570_v5  ;;  %v4932_v9 = vpop.f32.mrb[51].mxu0  ;;  %3626 = vmatmul.mubr.msk.f32.gmra.mrb[62].mxu1 %vm95_vm0, %v1942_v60 }
 0xdb3   :  { %v1943_v26 = vmul.f32 %v4932_v9, %v1767_v37  ;;  %v3107_v37 = vld [vmem:[%s5288_s1 + $0xa0] sm:$0xff] }
 0xdb5   :  { %3628 = vmatprep.mubr.msk.f32.mxu1 %vm95_vm0, %v1943_v26 }
 0xdb6   :  { %3629 = vmatmul.mubr.msk.f32.gmra.mrb[64].mxu1 %vm95_vm0, %v1944_v7 }
 0xdb7   :  { %3698 = vmatprep.mubr.msk.bf16.mxu1 %vm4071_vm1, %v4070_v15 }
 0xe6d   :  { %v3609_v17 = vpop.f32.mrb[50].mxu1 }
 0xe6e   :  { %v2082_v20 = vadd.f32 %v3609_v17, %v3104_v11  ;;  %v2076_v44 = vpop.f32.mrb[51].mxu1 }
 0xe6f   :  { %v4946_v22 = vadd.f32 %v3103_v13, %v2076_v44 }
 0xe70   :  { %v2162_v18 = vsel %vm95_vm0, %v2082_v20, -inf }
 0xe71   :  { %v2163_v33 = vrot.slane %v2162_v18, 4  ;;  %v2155_v19 = vsel %vm95_vm0, %v4946_v22, -inf  ;;  %v3612_v21 = vpop.f32.mrb[52].mxu1 }
 0xe72   :  { %v2156_v23 = vrot.slane %v2155_v19, 4  ;;  %v4957_v47 = vadd.f32 %v3612_v21, %v3106_v43  ;;  %v2086_v27 = vpop.f32.mrb[53].mxu1 }
 0xe73   :  { %v2164_v51 = vmax.f32 %v2162_v18, %v2163_v33  ;;  %v4959_v32 = vadd.f32 %v3105_v1, %v2086_v27 }
 0xe74   :  { %v2157_v0 = vmax.f32 %v2155_v19, %v2156_v23  ;;  %v2176_v5 = vsel %vm95_vm0, %v4957_v47, -inf }
 0xe75   :  { %v2165_v34 = vrot.slane %v2164_v51, 2  ;;  %v2177_v63 = vrot.slane %v2176_v5, 4  ;;  %v2169_v50 = vsel %vm95_vm0, %v4959_v32, -inf  ;;  %v3615_v8 = vpop.f32.mrb[54].mxu1 }
 0xe76   :  { %v2158_v10 = vrot.slane %v2157_v0, 2  ;;  %v2170_v4 = vrot.slane %v2169_v50, 4  ;;  %v4971_v59 = vadd.f32 %v3615_v8, %v3108_v55  ;;  %v2096_v2 = vpop.f32.mrb[55].mxu1 }
 0xe77   :  { %v2166_v46 = vmax.f32 %v2164_v51, %v2165_v34  ;;  %v2178_v48 = vmax.f32 %v2176_v5, %v2177_v63  ;;  %v4973_v6 = vadd.f32 %v3107_v37, %v2096_v2 }
 0xe78   :  { %v2159_v52 = vmax.f32 %v2157_v0, %v2158_v10  ;;  %v2171_v54 = vmax.f32 %v2169_v50, %v2170_v4  ;;  %v2190_v38 = vsel %vm95_vm0, %v4971_v59, -inf }
 0xe79   :  { %v2167_v45 = vrot.slane %v2166_v46, 1  ;;  %v2179_v31 = vrot.slane %v2178_v48, 2  ;;  %v2191_v53 = vrot.slane %v2190_v38, 4  ;;  %v2183_v39 = vsel %vm95_vm0, %v4973_v6, -inf  ;;  %v3618_v36 = vpop.f32.mrb[56].mxu1 }
 0xe7a   :  { %v2160_v3 = vrot.slane %v2159_v52, 1  ;;  %v2172_v60 = vrot.slane %v2171_v54, 2  ;;  %v2184_v12 = vrot.slane %v2183_v39, 4  ;;  %v4985_v7 = vadd.f32 %v3618_v36, %v3110_v49  ;;  %v2106_v26 = vpop.f32.mrb[57].mxu1 }
 0xe7b   :  { %v2168_v11 = vmax.f32 %v2166_v46, %v2167_v45  ;;  %v2180_v13 = vmax.f32 %v2178_v48, %v2179_v31  ;;  %v2192_v17 = vmax.f32 %v2190_v38, %v2191_v53  ;;  %v4987_v44 = vadd.f32 %v3109_v56, %v2106_v26  ;;  %v3112_v48 = vld [vmem:[%s5288_s1 + $0xc8] sm:$0xff] }
 0xe7c   :  { %v2161_v43 = vmax.f32 %v2159_v52, %v2160_v3  ;;  %v2173_v18 = vmax.f32 %v2171_v54, %v2172_v60  ;;  %v2185_v1 = vmax.f32 %v2183_v39, %v2184_v12  ;;  %v2204_v33 = vsel %vm95_vm0, %v4985_v7, -inf  ;;  %v3111_v54 = vld [vmem:[%s5288_s1 + $0xc0] sm:$0xff] }
 0xe7d   :  { %v2268_v19 = vsub.f32 %v2082_v20, %v2168_v11  ;;  %v2181_v21 = vrot.slane %v2180_v13, 1  ;;  %v2193_v23 = vrot.slane %v2192_v17, 2  ;;  %v2205_v27 = vrot.slane %v2204_v33, 4  ;;  %v3621_v51 = vpop.f32.mrb[58].mxu1 }
 0xe7e   :  { %v2267_v55 = vsub.f32 %v4946_v22, %v2161_v43  ;;  %v2174_v0 = vrot.slane %v2173_v18, 1  ;;  %v2186_v5 = vrot.slane %v2185_v1, 2  ;;  %v2197_v37 = vsel %vm95_vm0, %v4987_v44, -inf  ;;  %v2116_v34 = vpop.f32.mrb[59].mxu1 }
 0xe7f   :  { %v2285_v63 = vmul.f32 1.442695, %v2268_v19  ;;  %v2182_v50 = vmax.f32 %v2180_v13, %v2181_v21  ;;  %v2194_v8 = vmax.f32 %v2192_v17, %v2193_v23  ;;  %v2206_v10 = vmax.f32 %v2204_v33, %v2205_v27  ;;  %v3114_v13 = vld [vmem:[%s5288_s1 + $0xd8] sm:$0xff]  ;;  %v3113_v21 = vld [vmem:[%s5288_s1 + $0xd0] sm:$0xff] }
 0xe80   :  { %v2283_v4 = vmul.f32 1.442695, %v2267_v55  ;;  %v2175_v2 = vmax.f32 %v2173_v18, %v2174_v0  ;;  %v2187_v46 = vmax.f32 %v2185_v1, %v2186_v5  ;;  %v2198_v20 = vrot.slane %v2197_v37, 4 }
 0xe81   :  { %3989 = vpow2.f32 %v2285_v63  ;;  %v2270_v22 = vsub.f32 %v4957_v47, %v2182_v50  ;;  %v2195_v49 = vrot.slane %v2194_v8, 1  ;;  %v2207_v52 = vrot.slane %v2206_v10, 2  ;;  %v3624_v38 = vpop.f32.mrb[60].mxu1 }
 0xe82   :  { %3991 = vpow2.f32 %v2283_v4  ;;  %v2269_v56 = vsub.f32 %v4959_v32, %v2175_v2  ;;  %v2188_v45 = vrot.slane %v2187_v46, 1  ;;  %v2199_v31 = vmax.f32 %v2197_v37, %v2198_v20  ;;  %v2126_v53 = vpop.f32.mrb[61].mxu1  ;;  %v3115_v20 = vld [vmem:[%s5288_s1 + $0xe0] sm:$0xff] }
 0xe83   :  { %v2289_v39 = vmul.f32 1.442695, %v2270_v22  ;;  %v2196_v36 = vmax.f32 %v2194_v8, %v2195_v49  ;;  %v2208_v3 = vmax.f32 %v2206_v10, %v2207_v52  ;;  %v5002_v60 = vadd.f32 %v3621_v51, %v3112_v48 }
 0xe84   :  { %v2287_v12 = vmul.f32 1.442695, %v2269_v56  ;;  %v2189_v47 = vmax.f32 %v2187_v46, %v2188_v45  ;;  %v2200_v26 = vrot.slane %v2199_v31, 2  ;;  %v5004_v11 = vadd.f32 %v3111_v54, %v2116_v34 }
 0xe85   :  { %3993 = vpow2.f32 %v2289_v39  ;;  %v2272_v32 = vsub.f32 %v4971_v59, %v2196_v36  ;;  %v2209_v17 = vrot.slane %v2208_v3, 1  ;;  %v2218_v43 = vsel %vm95_vm0, %v5002_v60, -inf  ;;  %v3627_v18 = vpop.f32.mrb[62].mxu1  ;;  %v3118_v39 = vld [vmem:[%s5288_s1 + $0xf8] sm:$0xff] }
 0xe86   :  { %3995 = vpow2.f32 %v2287_v12  ;;  %v2271_v1 = vsub.f32 %v4973_v6, %v2189_v47  ;;  %v2201_v33 = vmax.f32 %v2199_v31, %v2200_v26  ;;  %v2219_v19 = vrot.slane %v2218_v43, 4  ;;  %v2136_v23 = vpop.f32.mrb[63].mxu1  ;;  %v3116_v6 = vld [vmem:[%s5288_s1 + $0xe8] sm:$0xff] }
 0xe87   :  { %v2293_v27 = vmul.f32 1.442695, %v2272_v32  ;;  %v2210_v51 = vmax.f32 %v2208_v3, %v2209_v17  ;;  %v2211_v59 = vsel %vm95_vm0, %v5004_v11, -inf  ;;  %v5018_v55 = vadd.f32 %v3624_v38, %v3114_v13 }
 0xe88   :  { %v2291_v0 = vmul.f32 1.442695, %v2271_v1  ;;  %v2202_v5 = vrot.slane %v2201_v33, 1  ;;  %v2220_v37 = vmax.f32 %v2218_v43, %v2219_v19  ;;  %v2212_v34 = vrot.slane %v2211_v59, 4 }
 0xe89   :  { %3997 = vpow2.f32 %v2293_v27  ;;  %v2274_v63 = vsub.f32 %v4985_v7, %v2210_v51  ;;  %v2232_v50 = vsel %vm95_vm0, %v5018_v55, -inf  ;;  %v5026_v8 = vadd.f32 %v3113_v21, %v2126_v53  ;;  %v3630_v10 = vpop.f32.mrb[64].mxu1  ;;  %v3117_v27 = vld [vmem:[%s5288_s1 + $0xf0] sm:$0xff] }
 0xe8a   :  { %3999 = vpow2.f32 %v2291_v0  ;;  %v2203_v4 = vmax.f32 %v2201_v33, %v2202_v5  ;;  %v2221_v2 = vrot.slane %v2220_v37, 2  ;;  %v2213_v46 = vmax.f32 %v2211_v59, %v2212_v34  ;;  %v2146_v48 = vpop.f32.mrb[65].mxu1 }
 0xe8b   :  { %v5031_v22 = vpop.eup %3989  ;;  %v2297_v49 = vmul.f32 1.442695, %v2274_v63  ;;  %v2233_v52 = vrot.slane %v2232_v50, 4  ;;  %v2225_v7 = vsel %vm95_vm0, %v5026_v8, -inf  ;;  %v5035_v54 = vadd.f32 %v3627_v18, %v3116_v6 }
 0xe8c   :  { %v5037_v38 = vpop.eup %3991  ;;  %v2273_v56 = vsub.f32 %v4987_v44, %v2203_v4  ;;  %v2222_v45 = vmax.f32 %v2220_v37, %v2221_v2  ;;  %v2214_v31 = vrot.slane %v2213_v46, 2  ;;  %v2226_v53 = vrot.slane %v2225_v7, 4 }
 0xe8d   :  { %4001 = vpow2.f32 %v2297_v49  ;;  %v2234_v36 = vmax.f32 %v2232_v50, %v2233_v52  ;;  %v2246_v3 = vsel %vm95_vm0, %v5035_v54, -inf  ;;  %v5045_v12 = vadd.f32 %v3115_v20, %v2136_v23 }
 0xe8e   :  { %v2295_v47 = vmul.f32 1.442695, %v2273_v56  ;;  %v2223_v26 = vrot.slane %v2222_v45, 1  ;;  %v2215_v13 = vmax.f32 %v2213_v46, %v2214_v31  ;;  %v2227_v32 = vmax.f32 %v2225_v7, %v2226_v53 }
 0xe8f   :  { %v5047_v17 = vpop.eup %3993  ;;  %v2235_v44 = vrot.slane %v2234_v36, 2  ;;  %v2247_v43 = vrot.slane %v2246_v3, 4  ;;  %v2239_v18 = vsel %vm95_vm0, %v5045_v12, -inf  ;;  %v5051_v1 = vadd.f32 %v3630_v10, %v3118_v39 }
 0xe90   :  { %v5053_v33 = vpop.eup %3995  ;;  %4003 = vpow2.f32 %v2295_v47  ;;  %v2224_v19 = vmax.f32 %v2222_v45, %v2223_v26  ;;  %v2216_v21 = vrot.slane %v2215_v13, 1  ;;  %v2228_v23 = vrot.slane %v2227_v32, 2 }
 0xe91   :  { %v2236_v51 = vmax.f32 %v2234_v36, %v2235_v44  ;;  %v2248_v59 = vmax.f32 %v2246_v3, %v2247_v43  ;;  %v2240_v0 = vrot.slane %v2239_v18, 4  ;;  %v2260_v5 = vsel %vm95_vm0, %v5051_v1, -inf }
 0xe92   :  { %v2276_v37 = vsub.f32 %v5002_v60, %v2224_v19  ;;  %v2217_v34 = vmax.f32 %v2215_v13, %v2216_v21  ;;  %v2229_v6 = vmax.f32 %v2227_v32, %v2228_v23  ;;  %v2261_v63 = vrot.slane %v2260_v5, 4 }
 0xe93   :  { %v5061_v50 = vpop.eup %3997  ;;  %v2237_v10 = vrot.slane %v2236_v51, 1  ;;  %v2249_v4 = vrot.slane %v2248_v59, 2  ;;  %v2241_v2 = vmax.f32 %v2239_v18, %v2240_v0  ;;  %v2147_v46 = vadd.f32 %v3117_v27, %v2146_v48 }
 0xe94   :  { %v5063_v20 = vpop.eup %3999  ;;  %v2301_v49 = vmul.f32 1.442695, %v2276_v37  ;;  %v2275_v52 = vsub.f32 %v5004_v11, %v2217_v34  ;;  %v2230_v7 = vrot.slane %v2229_v6, 1  ;;  %v2262_v56 = vmax.f32 %v2260_v5, %v2261_v63 }
 0xe95   :  { %v2238_v45 = vmax.f32 %v2236_v51, %v2237_v10  ;;  %v2250_v31 = vmax.f32 %v2248_v59, %v2249_v4  ;;  %v2242_v53 = vrot.slane %v2241_v2, 2  ;;  %v2253_v60 = vsel %vm95_vm0, %v2147_v46, -inf }
 0xe96   :  { %4005 = vpow2.f32 %v2301_v49  ;;  %v2299_v39 = vmul.f32 1.442695, %v2275_v52  ;;  %v2231_v36 = vmax.f32 %v2229_v6, %v2230_v7  ;;  %v2263_v3 = vrot.slane %v2262_v56, 2 }
 0xe97   :  { %v5067_v47 = vpop.eup %4001  ;;  %v2278_v48 = vsub.f32 %v5018_v55, %v2238_v45  ;;  %v2251_v26 = vrot.slane %v2250_v31, 1  ;;  %v2243_v13 = vmax.f32 %v2241_v2, %v2242_v53  ;;  %v2254_v32 = vrot.slane %v2253_v60, 4 }
 0xe98   :  { %4007 = vpow2.f32 %v2299_v39  ;;  %v2277_v11 = vsub.f32 %v5026_v8, %v2231_v36  ;;  %v2264_v44 = vmax.f32 %v2262_v56, %v2263_v3  ;;  %v3873_v43 = vpack.i.bf16 %v5031_v22, %v5037_v38 }
 0xe99   :  { %v2305_v18 = vmul.f32 1.442695, %v2278_v48  ;;  %v2252_v19 = vmax.f32 %v2250_v31, %v2251_v26  ;;  %v2244_v21 = vrot.slane %v2243_v13, 1  ;;  %v2255_v23 = vmax.f32 %v2253_v60, %v2254_v32  ;;  %v2332_v48 = vpop.permute.xlu0 %2331 }
 0xe9a   :  { %v5073_v27 = vpop.eup %4003  ;;  %v2303_v51 = vmul.f32 1.442695, %v2277_v11  ;;  %v2265_v59 = vrot.slane %v2264_v44, 1  ;;  %3874 = vrot.lane.b32.xlu1 %v3873_v43, %s4073_s29  ;;  %v3878_v55 = vpack.i.bf16 %v5047_v17, %v5053_v33  ;;  %v3883_v8 = vpack.i.bf16 %v5061_v50, %v5063_v20 }
 0xe9b   :  { %v2280_v0 = vsub.f32 %v5035_v54, %v2252_v19  ;;  %v2245_v5 = vmax.f32 %v2243_v13, %v2244_v21  ;;  %v2256_v37 = vrot.slane %v2255_v23, 2  ;;  %4009 = vpow2.f32 %v2305_v18 }
 0xe9c   :  { %v2266_v34 = vmax.f32 %v2264_v44, %v2265_v59  ;;  %3884 = vrot.lane.b32.xlu0 %v3883_v8, %s4073_s29  ;;  %v3888_v6 = vpack.i.bf16 %v5067_v47, %v5073_v27  ;;  %4011 = vpow2.f32 %v2303_v51 }
 0xe9d   :  { %v2309_v63 = vmul.f32 1.442695, %v2280_v0  ;;  %v2279_v10 = vsub.f32 %v5045_v12, %v2245_v5  ;;  %v2257_v4 = vmax.f32 %v2255_v23, %v2256_v37  ;;  %v2338_v13 = vpop.permute.xlu0 %2337 }
 0xe9e   :  { %v2282_v2 = vsub.f32 %v5051_v1, %v2266_v34  ;;  %3879 = vrot.lane.b32.xlu1 %v3878_v55, %s4073_s29 }
 0xe9f   :  { %4013 = vpow2.f32 %v2309_v63  ;;  %v2307_v54 = vmul.f32 1.442695, %v2279_v10  ;;  %v2258_v49 = vrot.slane %v2257_v4, 1 }
 0xea0   :  { %v5087_v52 = vpop.eup %4005  ;;  %2353 = vrot.lane.b32.xlu0 %v4912_v29, %s4072_s24  ;;  %v2313_v7 = vmul.f32 1.442695, %v2282_v2 }
 0xea1   :  { %4015 = vpow2.f32 %v2307_v54  ;;  %v2259_v56 = vmax.f32 %v2257_v4, %v2258_v49  ;;  %v2340_v11 = vpop.permute.xlu0 %2339  ;;  %v2382_v4 = vmul.f32 %v5047_v17, %v2338_v13 }
 0xea2   :  { %v5091_v45 = vpop.eup %4007  ;;  %2351 = vrot.lane.b32.xlu1 %v4916_v57, %s4072_s24  ;;  %4017 = vpow2.f32 %v2313_v7  ;;  %v2383_v55 = vmul.f32 %v5063_v20, %v2340_v11 }
 0xea3   :  { %v2281_v12 = vsub.f32 %v2147_v46, %v2259_v56  ;;  %v3893_v1 = vpack.i.bf16 %v5087_v52, %v5091_v45 }
 0xea5   :  { %v2311_v31 = vmul.f32 1.442695, %v2281_v12  ;;  %3894 = vrot.lane.b32.xlu0 %v3893_v1, %s4073_s29  ;;  %v5098_v53 = vpop.eup %4009  ;;  %v2346_v43 = vpop.permute.xlu0 %2345 }
 0xea6   :  { %3889 = vrot.lane.b32.xlu1 %v3888_v6, %s4073_s29  ;;  %v5101_v29 = vpop.eup %4011 }
 0xea7   :  { %4019 = vpow2.f32 %v2311_v31  ;;  %v3898_v57 = vpack.i.bf16 %v5098_v53, %v5101_v29 }
 0xea9   :  { %v5103_v60 = vpop.eup %4013  ;;  %2355 = vrot.lane.b32.xlu0 %v4924_v16, %s4072_s24  ;;  %v2334_v16 = vpop.permute.xlu1 %2333 }
 0xeaa   :  { %2357 = vrot.lane.b32.xlu1 %v4920_v58, %s4072_s24  ;;  %v2348_v19 = vpop.permute.xlu0 %2347  ;;  %v2380_v51 = vmul.f32 %v5031_v22, %v2334_v16 }
 0xeab   :  { %v5111_v46 = vpop.eup %4015 }
 0xeac   :  { %v3903_v39 = vpack.i.bf16 %v5103_v60, %v5111_v46  ;;  %v5117_v36 = vpop.eup %4017 }
 0xead   :  { %v2336_v26 = vpop.permute.xlu1 %2335 }
 0xeae   :  { %3899 = vrot.lane.b32.xlu1 %v3898_v57, %s4073_s29  ;;  %3904 = vrot.lane.b32.xlu0 %v3903_v39, %s4073_s29  ;;  %v2381_v10 = vmul.f32 %v5053_v33, %v2336_v26  ;;  %v2387_v57 = vmul.f32 %v5091_v45, %v2348_v19  ;;  %v2386_v26 = vmul.f32 %v5067_v47, %v2346_v43 }
 0xeb1   :  { %v5119_v3 = vpop.eup %4019  ;;  %v2342_v32 = vpop.permute.xlu1 %2341 }
 0xeb2   :  { %2359 = vrot.lane.b32.xlu1 %v4932_v9, %s4072_s24  ;;  %2361 = vrot.lane.b32.xlu0 %v4928_v61, %s4072_s24  ;;  %v3908_v58 = vpack.i.bf16 %v5117_v36, %v5119_v3  ;;  %v2379_v61 = vmul.f32 %v5037_v38, %v2332_v48  ;;  %v2384_v8 = vmul.f32 %v5061_v50, %v2342_v32 }
 0xeb5   :  { %v2344_v44 = vpop.permute.xlu1 %2343 }
 0xeb6   :  { %3909 = vrot.lane.b32.xlu1 %v3908_v58, %s4073_s29  ;;  %v2385_v48 = vmul.f32 %v5073_v27, %v2344_v44 }
 0xeb9   :  { %v2350_v18 = vpop.permute.xlu1 %2349 }
 0xeba   :  { %v2388_v39 = vmul.f32 %v5087_v52, %v2350_v18 }
 0xf0c   :  { %v3875_v21 = vpop.permute.xlu1 %3874 }
 0xf0d   :  { %v3877_v9 = vunpack.i.h.bf16 %v3875_v21  ;;  %v3876_v23 = vunpack.i.l.bf16 %v3875_v21 }
 0xf0e   :  { %v3885_v59 = vpop.permute.xlu0 %3884 }
 0xf0f   :  { %v2459_v0 = vsel %vm95_vm0, %v2379_v61, %v3876_v23  ;;  %v2460_v5 = vsel %vm95_vm0, %v2380_v51, %v3877_v9  ;;  %v3887_v37 = vunpack.i.h.bf16 %v3885_v59  ;;  %v3886_v34 = vunpack.i.l.bf16 %v3885_v59 }
 0xf10   :  { %v3880_v6 = vpop.permute.xlu1 %3879  ;;  %v3777_v63 = vpack.c.bf16 %v2460_v5, %v2459_v0 }
 0xf11   :  { %v3882_v38 = vunpack.i.h.bf16 %v3880_v6  ;;  %v3881_v2 = vunpack.i.l.bf16 %v3880_v6  ;;  %v2463_v22 = vsel %vm95_vm0, %v2383_v55, %v3886_v34  ;;  %v2464_v20 = vsel %vm95_vm0, %v2384_v8, %v3887_v37 }
 0xf12   :  { %3778 = vmatprep.subr.bf16.mxu0 %v3777_v63  ;;  %v2354_v50 = vpop.permute.xlu0 %2353  ;;  %v3785_v54 = vpack.c.bf16 %v2464_v20, %v2463_v22 }
 0xf13   :  { %3780 = vmatpush3.bf16.msra.mxu0 %v3777_v63  ;;  %v2461_v49 = vsel %vm95_vm0, %v2381_v10, %v3881_v2  ;;  %v2462_v7 = vsel %vm95_vm0, %v2382_v4, %v3882_v38  ;;  %v2390_v27 = vmul.f32 %v5098_v53, %v2354_v50 }
 0xf14   :  { %v2352_v56 = vpop.permute.xlu1 %2351  ;;  %v3781_v12 = vpack.c.bf16 %v2462_v7, %v2461_v49 }
 0xf15   :  { %v2389_v52 = vmul.f32 %v5101_v29, %v2352_v56 }
 0xf16   :  { %3782 = vmatprep.subr.bf16.mxu0 %v3781_v12 }
 0xf17   :  { %3784 = vmatpush3.bf16.msra.mxu0 %v3781_v12  ;;  %v3895_v33 = vpop.permute.xlu0 %3894 }
 0xf18   :  { %v3890_v17 = vpop.permute.xlu1 %3889  ;;  %3786 = vmatprep.subr.bf16.mxu0 %v3785_v54  ;;  %v3897_v1 = vunpack.i.h.bf16 %v3895_v33  ;;  %v3896_v31 = vunpack.i.l.bf16 %v3895_v33 }
 0xf19   :  { %v3892_v58 = vunpack.i.h.bf16 %v3890_v17  ;;  %v3891_v16 = vunpack.i.l.bf16 %v3890_v17 }
 0xf1a   :  { %v2467_v13 = vsel %vm95_vm0, %v2387_v57, %v3896_v31  ;;  %v2468_v32 = vsel %vm95_vm0, %v2388_v39, %v3897_v1  ;;  %v2571_v31 = vrot.slane %v4753_v40, %v1237_v28 }
 0xf1b   :  { %3788 = vmatpush3.bf16.msra.mxu0 %v3785_v54  ;;  %v2465_v11 = vsel %vm95_vm0, %v2385_v48, %v3891_v16  ;;  %v2466_v21 = vsel %vm95_vm0, %v2386_v26, %v3892_v58  ;;  %v2356_v9 = vpop.permute.xlu0 %2355  ;;  %v3793_v23 = vpack.c.bf16 %v2468_v32, %v2467_v13  ;;  %v3930_v54 = vld [vmem:[%s5290_s8 + $0x18] sm:$0xff]  }
 0xf1c   :  { %v2358_v45 = vpop.permute.xlu1 %2357  ;;  %v3789_v19 = vpack.c.bf16 %v2466_v21, %v2465_v11  ;;  %v2391_v43 = vmul.f32 %v5111_v46, %v2356_v9 }
 0xf1d   :  { %v2392_v47 = vmul.f32 %v5103_v60, %v2358_v45 }
 0xf1e   :  { %3790 = vmatprep.subr.bf16.mxu0 %v3789_v19 }
 0xf1f   :  { %3792 = vmatpush3.bf16.msra.mxu0 %v3789_v19 }
 0xf20   :  { %v3900_v44 = vpop.permute.xlu1 %3899  ;;  %3794 = vmatprep.subr.bf16.mxu0 %v3793_v23  ;;  %v3905_v18 = vpop.permute.xlu0 %3904 }
 0xf21   :  { %v3902_v61 = vunpack.i.h.bf16 %v3900_v44  ;;  %v3901_v51 = vunpack.i.l.bf16 %v3900_v44  ;;  %v3907_v59 = vunpack.i.h.bf16 %v3905_v18  ;;  %v3906_v55 = vunpack.i.l.bf16 %v3905_v18  ;;  %v3932_v44 = vld [vmem:[%s5291_s9 + $0x18] sm:$0xff]   ;;  %v3934_v18 = vld [vmem:[%s5292_s11 + $0x48] sm:$0xff]  }
 0xf23   :  { %3796 = vmatpush3.bf16.msra.mxu0 %v3793_v23  ;;  %v2469_v8 = vsel %vm95_vm0, %v2389_v52, %v3901_v51  ;;  %v2470_v0 = vsel %vm95_vm0, %v2390_v27, %v3902_v61  ;;  %v2471_v29 = vsel %vm95_vm0, %v2391_v43, %v3906_v55  ;;  %v2472_v53 = vsel %vm95_vm0, %v2392_v47, %v3907_v59  ;;  %v3931_v47 = vld [vmem:[%s5291_s9 + $0x10] sm:$0xff]   ;;  %v3933_v43 = vld [vmem:[%s5292_s11 + $0x40] sm:$0xff]   ;;  %v3936_v51 = vld [vmem:[%s5292_s11 + $0x58] sm:$0xff]  }
 0xf24   :  { %v2360_v5 = vpop.permute.xlu1 %2359  ;;  %v3797_v60 = vpack.c.bf16 %v2470_v0, %v2469_v8  ;;  %v2362_v37 = vpop.permute.xlu0 %2361  ;;  %v3801_v34 = vpack.c.bf16 %v2472_v53, %v2471_v29  ;;  %3683 = vmatpush3.bf16.msra.mxu1 %v3933_v43  ;;  %v3935_v61 = vld [vmem:[%s5292_s11 + $0x50] sm:$0xff]   ;;  %v3937_v59 = vld [vmem:[%s5292_s11 + $0x60] sm:$0xff]   ;;  %v3938_v55 = vld [vmem:[%s5292_s11 + $0x68] sm:$0xff]  }
 0xf25   :  { %v2394_v46 = vmul.f32 %v5117_v36, %v2362_v37  ;;  %v2393_v63 = vmul.f32 %v5119_v3, %v2360_v5  ;;  %v4068_v36 = vld [vmem:[%s5289_s4 + $0x8] sm:$0xff]  ;;  %v3929_v3 = vld [vmem:[%s5290_s8 + $0x10] sm:$0xff]   ;;  %3684 = vmatprep.subr.bf16.mxu1 %v4070_v15 }
 0xf26   :  { %3798 = vmatprep.subr.bf16.mxu0 %v3797_v60 }
 0xf27   :  { %3800 = vmatpush3.bf16.msra.mxu0 %v3797_v60 }
 0xf28   :  { %v3910_v6 = vpop.permute.xlu1 %3909  ;;  %3802 = vmatprep.subr.bf16.mxu0 %v3801_v34  ;;  %3685 = vmatpush3.bf16.msra.mxu1 %v3934_v18  ;;  %v2899_v18 = vld [vmem:[%s5294_s14 + $0x18] sm:$0xff] }
 0xf29   :  { %v3912_v10 = vunpack.i.h.bf16 %v3910_v6  ;;  %v3911_v4 = vunpack.i.l.bf16 %v3910_v6  ;;  %3686 = vmatprep.subr.bf16.mxu1 %v4070_v15 }
 0xf2b   :  { %3804 = vmatpush3.bf16.msra.mxu0 %v3801_v34  ;;  %v2473_v38 = vsel %vm95_vm0, %v2393_v63, %v3911_v4  ;;  %v2474_v2 = vsel %vm95_vm0, %v2394_v46, %v3912_v10  ;;  %v4069_v34 = vld [vmem:[%s5283_s12 + $0x8] sm:$0x3f] }
 0xf2c   :  { %v3805_v22 = vpack.c.bf16 %v2474_v2, %v2473_v38  ;;  %3687 = vmatpush3.bf16.msra.mxu1 %v3935_v61  ;;  %v2659_v46 = vrot.slane %v4069_v34, %v1325_v35  ;;  %v2665_v38 = vrot.slane %v4069_v34, %v1331_v41  ;;  %v3940_v35 = vld [vmem:[%s5292_s11 + $0x78] sm:$0xff]   ;;  %v3147_v41 = vld [vmem:[%s5293_s10 + $0x1] ss:$0 sm:$0xff] }
 0xf2d   :  { %3688 = vmatprep.subr.bf16.mxu1 %v4070_v15 }
 0xf2e   :  { %3806 = vmatprep.subr.bf16.mxu0 %v3805_v22 }
 0xf2f   :  { %3808 = vmatpush3.bf16.msra.mxu0 %v3805_v22 }
 0xf30   :  { %3666 = vmatprep.subr.bf16.mxu0 %v4070_v15  ;;  %3689 = vmatpush3.bf16.msra.mxu1 %v3936_v51 }
 0xf31   :  { %3690 = vmatprep.subr.bf16.mxu1 %v4070_v15 }
 0xf32   :  { %3664 = vmatmul.mubr.f32.vlgmr.msra.gmra.mrb[52].mxu0 %v4068_v36 }
 0xf33   :  { %3670 = vmatprep.mubr.msk.bf16.mxu0 %vm4071_vm1, %v4070_v15  ;;  %3667 = vmatpush3.bf16.msra.mxu0 %v3929_v3 }
 0xf34   :  { %3668 = vmatprep.subr.bf16.mxu0 %v4070_v15  ;;  %3691 = vmatpush3.bf16.msra.mxu1 %v3937_v59 }
 0xf35   :  { %3692 = vmatprep.subr.bf16.mxu1 %v4070_v15 }
 0xf37   :  { %3669 = vmatpush3.bf16.msra.mxu0 %v3930_v54 }
 0xf38   :  { %3674 = vmatprep.subr.bf16.mxu0 %v4070_v15  ;;  %3693 = vmatpush3.bf16.msra.mxu1 %v3938_v55 }
 0xf39   :  { %3694 = vmatprep.subr.bf16.mxu1 %v4070_v15 }
0x1005   :  { %v3665_v20 = vpop.f32.mrb[52].mxu0 }
0x1006   :  { %4021 = vrcp.f32 %v3665_v20  ;;  %v2541_v50 = vpop.f32.mrb[53].mxu0 }
0x1007   :  { %4023 = vrcp.f32 %v2541_v50 }
0x1010   :  { %v4022_v49 = vpop.eup %4021 }
0x1011   :  { %v4024_v7 = vpop.eup %4023  ;;  %2556 = vrot.lane.b32.xlu1 %v4022_v49, %s4072_s24 }
0x1012   :  { %2554 = vrot.lane.b32.xlu0 %v4024_v7, %s4072_s24 }
0x1083   :  { %v2557_v56 = vpop.permute.xlu1 %2556 }
0x1084   :  { %v2561_v12 = vmul.f32 %v3665_v20, %v2557_v56  ;;  %v2555_v33 = vpop.permute.xlu0 %2554  ;;  %v3939_v20 = vld [vmem:[%s5292_s11 + $0x70] sm:$0xff]  }
0x1085   :  { %v2560_v17 = vmul.f32 %v2555_v33, %v2541_v50  ;;  %3695 = vmatpush3.bf16.msra.mxu1 %v3939_v20 }
0x1086   :  { %3696 = vmatprep.subr.bf16.mxu1 %v4070_v15 }
0x1087   :  { %v2562_v1 = vpack.c.bf16 %v2561_v12, %v2560_v17 }
0x1089   :  { %3671 = vmatmul.mubr.msk.bf16.vlgmr.msra.gmra.mrb[56].mxu0 %vm95_vm0, %v2562_v1  ;;  %3697 = vmatpush3.bf16.msra.mxu1 %v3940_v35 }
0x108a   :  { %3678 = vmatprep.mubr.msk.bf16.mxu0 %vm4071_vm1, %v4070_v15  ;;  %3675 = vmatpush3.bf16.msra.mxu0 %v3931_v47  ;;  %v2897_v47 = vld [vmem:[%s5294_s14 + $0x8] sm:$0xff] }
0x108b   :  { %3676 = vmatprep.subr.bf16.mxu0 %v4070_v15  ;;  %v2765_v15 = vrot.slane %v4069_v34, %v1428_v14 }
0x108e   :  { %3677 = vmatpush3.bf16.msra.mxu0 %v3932_v44  ;;  %v2898_v44 = vld [vmem:[%s5294_s14 + $0x10] sm:$0xff] }
0x108f   :  { %v3813_v61 = vpack.c.bf16 %v2899_v18, %v2898_v44 }
0x115c   :  { %v2621_v57 = vpop.f32.mrb[56].mxu0 }
0x115d   :  { %v2622_v39 = vadd.f32 %v2621_v57, %v2571_v31  ;;  %v3672_v58 = vpop.f32.mrb[57].mxu0 }
0x115e   :  { %v2624_v16 = vpop.f32.mrb[58].mxu0 }
0x115f   :  { %v5183_v48 = vadd.f32 %v2622_v39, %v4730_v42  ;;  %v2625_v26 = vadd.f32 %v2624_v16, %v2571_v31  ;;  %v3673_v13 = vpop.f32.mrb[59].mxu0 }
0x1161   :  { %v5186_v32 = vadd.f32 %v2625_v26, %v4733_v62  ;;  %v2630_v11 = vsel %vm95_vm0, %v5183_v48, 0.0 }
0x1162   :  { %2631 = vadd.xlane.f32.xlu0 %v2630_v11 }
0x1163   :  { %v2633_v21 = vsel %vm95_vm0, %v5186_v32, 0.0 }
0x1164   :  { %2634 = vadd.xlane.f32.xlu1 %v2633_v21 }
0x11ef   :  { %v2632_v28 = vpop.xlane.xlu0 %2631 }
0x11f0   :  { %v2636_v40 = vmul.f32 0.03125, %v2632_v28 }
0x11f1   :  { %v2635_v9 = vpop.xlane.xlu1 %2634 }
0x11f2   :  { %v2638_v23 = vsub.f32 %v5183_v48, %v2636_v40  ;;  %v2637_v42 = vmul.f32 0.03125, %v2635_v9 }
0x11f4   :  { %v2639_v45 = vsub.f32 %v5186_v32, %v2637_v42  ;;  %v2640_v19 = vmul.f32 %v2638_v23, %v2638_v23 }
0x11f6   :  { %v2642_v62 = vsel %vm95_vm0, %v2640_v19, 0.0  ;;  %v2641_v52 = vmul.f32 %v2639_v45, %v2639_v45 }
0x11f7   :  { %2643 = vadd.xlane.f32.xlu0 %v2642_v62 }
0x11f8   :  { %v2645_v27 = vsel %vm95_vm0, %v2641_v52, 0.0 }
0x11fb   :  { %2646 = vadd.xlane.f32.xlu0 %v2645_v27 }
0x1284   :  { %v2644_v8 = vpop.xlane.xlu0 %2643 }
0x1285   :  { %v2648_v0 = vmul.f32 0.03125, %v2644_v8 }
0x1287   :  { %v2650_v29 = vadd.f32 1e-05, %v2648_v0 }
0x1288   :  { %v2647_v53 = vpop.xlane.xlu0 %2646 }
0x1289   :  { %4025 = vrsqrt.f32 %v2650_v29  ;;  %v2649_v5 = vmul.f32 0.03125, %v2647_v53  ;;  %v2857_v53 = vld [vmem:[%s5295_s13] sm:$0x3] }
0x128a   :  { %v2893_v34 = vrot.slane %v2857_v53, %v4189_v30 }
0x128b   :  { %v2651_v60 = vadd.f32 1e-05, %v2649_v5  ;;  %v2887_v5 = vrot.slane %v2857_v53, %v4182_v25 }
0x128d   :  { %4027 = vrsqrt.f32 %v2651_v60 }
0x1293   :  { %v4026_v37 = vpop.eup %4025 }
0x1294   :  { %v2654_v6 = vmul.f32 %v4026_v37, %v2638_v23 }
0x1296   :  { %v2660_v10 = vmul.f32 %v2659_v46, %v2654_v6 }
0x1297   :  { %v4028_v63 = vpop.eup %4027 }
0x1298   :  { %v2655_v4 = vmul.f32 %v4028_v63, %v2639_v45  ;;  %v2666_v22 = vadd.f32 %v2665_v38, %v2660_v10 }
0x129a   :  { %v2661_v2 = vmul.f32 %v2659_v46, %v2655_v4 }
0x129c   :  { %v2667_v36 = vadd.f32 %v2665_v38, %v2661_v2  ;;  %v3175_v2 = vld [vmem:[%s5296_s15] ss:$0 sm:$0xff] }
0x129e   :  { %v2668_v3 = vpack.c.bf16 %v2667_v36, %v2666_v22 }
0x12a0   :  { %3679 = vmatmul.mubr.msk.bf16.vlgmr.msra.gmra.mrb[60].mxu0 %vm95_vm0, %v2668_v3 }
0x1373   :  { %v2731_v50 = vpop.f32.mrb[60].mxu0 }
0x1374   :  { %v2732_v54 = vadd.f32 %v3147_v41, %v2731_v50  ;;  %v3680_v49 = vpop.f32.mrb[61].mxu0 }
0x1375   :  { %v2734_v7 = vpop.f32.mrb[62].mxu0 }
0x1376   :  { %v2740_v56 = vmul.f32 0.01, %v2732_v54  ;;  %v2735_v12 = vadd.f32 %v3147_v41, %v2734_v7  ;;  %v3681_v33 = vpop.f32.mrb[63].mxu0  ;;  %vm2738_vm5 = vcmp.ge.f32.partialorder %v2732_v54, 0.0 }
0x1378   :  { %vm2739_vm6 = vcmp.ge.f32.partialorder %v2735_v12, 0.0  ;;  %v2741_v17 = vmul.f32 0.01, %v2735_v12  ;;  %v2742_v1 = vsel %vm2738_vm5, %v2732_v54, %v2740_v56 }
0x137a   :  { %v2743_v31 = vsel %vm2739_vm6, %v2735_v12, %v2741_v17 }
0x137b   :  { %v2744_v57 = vpack.c.bf16 %v2743_v31, %v2742_v1 }
0x137d   :  { %3699 = vmatmul.mubr.bf16.vlgmr.msra.gmra.mrb[68].mxu1 %v2744_v57 }
0x1450   :  { %v2848_v39 = vpop.f32.mrb[68].mxu1 }
0x1451   :  { %v2849_v58 = vadd.f32 %v2848_v39, %v2765_v15  ;;  %v3700_v16 = vpop.f32.mrb[69].mxu1 }
0x1452   :  { %v2851_v26 = vpop.f32.mrb[70].mxu1 }
0x1453   :  { %v2852_v13 = vadd.f32 %v2851_v26, %v2765_v15  ;;  %v3701_v11 = vpop.f32.mrb[71].mxu1  ;;  %v2855_v21 = vadd.f32 %v2849_v58, %v5183_v48 }
0x1455   :  { %v2858_v28 = vsel %vm95_vm0, %v2855_v21, 0.0  ;;  %v2856_v40 = vadd.f32 %v2852_v13, %v5186_v32  ;;  %v2896_v32 = vld [vmem:[%s5294_s14] sm:$0xff] }
0x1456   :  { %2859 = vadd.xlane.f32.xlu0 %v2858_v28  ;;  %v3809_v43 = vpack.c.bf16 %v2897_v47, %v2896_v32 }
0x1457   :  { %v2861_v9 = vsel %vm95_vm0, %v2856_v40, 0.0 }
0x1458   :  { %2862 = vadd.xlane.f32.xlu1 %v2861_v9  ;;  %3810 = vmatprep.subr.bf16.mxu0 %v3809_v43 }
0x1459   :  { %3812 = vmatpush3.bf16.msra.mxu0 %v3809_v43 }
0x145a   :  { %3814 = vmatprep.subr.bf16.mxu0 %v3813_v61 }
0x145d   :  { %3816 = vmatpush3.bf16.msra.mxu0 %v3813_v61 }
0x14e3   :  { %v2860_v23 = vpop.xlane.xlu0 %2859 }
0x14e4   :  { %v2864_v42 = vmul.f32 0.03125, %v2860_v23 }
0x14e5   :  { %v2863_v24 = vpop.xlane.xlu1 %2862 }
0x14e6   :  { %v2866_v14 = vsub.f32 %v2855_v21, %v2864_v42  ;;  %v2865_v45 = vmul.f32 0.03125, %v2863_v24 }
0x14e8   :  { %v2867_v19 = vsub.f32 %v2856_v40, %v2865_v45  ;;  %v2868_v62 = vmul.f32 %v2866_v14, %v2866_v14 }
0x14ea   :  { %v2870_v52 = vsel %vm95_vm0, %v2868_v62, 0.0  ;;  %v2869_v27 = vmul.f32 %v2867_v19, %v2867_v19 }
0x14eb   :  { %2871 = vadd.xlane.f32.xlu0 %v2870_v52 }
0x14ec   :  { %v2873_v48 = vsel %vm95_vm0, %v2869_v27, 0.0 }
0x14ed   :  { %2874 = vadd.xlane.f32.xlu1 %v2873_v48 }
0x1578   :  { %v2872_v51 = vpop.xlane.xlu0 %2871 }
0x1579   :  { %v2876_v59 = vmul.f32 0.03125, %v2872_v51 }
0x157a   :  { %v2875_v55 = vpop.xlane.xlu1 %2874 }
0x157b   :  { %v2878_v8 = vadd.f32 1e-05, %v2876_v59  ;;  %v2877_v0 = vmul.f32 0.03125, %v2875_v55 }
0x157d   :  { %4029 = vrsqrt.f32 %v2878_v8  ;;  %v2879_v29 = vadd.f32 1e-05, %v2877_v0 }
0x157f   :  { %4031 = vrsqrt.f32 %v2879_v29 }
0x1587   :  { %v4030_v60 = vpop.eup %4029 }
0x1588   :  { %v2882_v37 = vmul.f32 %v4030_v60, %v2866_v14 }
0x1589   :  { %v4032_v46 = vpop.eup %4031 }
0x158a   :  { %v2883_v6 = vmul.f32 %v4032_v46, %v2867_v19  ;;  %v2888_v63 = vmul.f32 %v2887_v5, %v2882_v37 }
0x158c   :  { %v2889_v10 = vmul.f32 %v2887_v5, %v2883_v6  ;;  %v2894_v4 = vadd.f32 %v2893_v34, %v2888_v63 }
0x158e   :  { %v2895_v38 = vadd.f32 %v2893_v34, %v2889_v10  ;;  %3710 = vmatprep.mubr.msk.f32.mxu0 %vm95_vm0, %v2894_v4 }
0x1590   :  { %3711 = vmatmul.mubr.msk.f32.vlgmr.msra.gmra.mrb[54].mxu0 %vm95_vm0, %v2895_v38 }
0x1663   :  { %v3712_v22 = vpop.f32.mrb[54].mxu0 }
0x1664   :  { %v2985_v25 = vadd.f32 %v3712_v22, %v3175_v2  ;;  %v2979_v36 = vpop.f32.mrb[55].mxu0 }
0x1665   :  { %v2980_v3 = vadd.f32 %v3175_v2, %v2979_v36 }
0x1666   :  { %2989 = vst [vmem:[%s5297_s16 + $0x8] sm:$0xff] %v2985_v25 }
0x1667   :  { %2988 = vst [vmem:[%s5297_s16] sm:$0xff] %v2980_v3 }

</bundles_post_ra>
